<compile_context>
chip_gen: v6e
topology: v6e:2x2x1
jax: 0.10.0
libtpu: 0.0.40
codegen_flags: <defaults>
</compile_context>

<pallas_src>
import math
from functools import partial

import jax
import jax.numpy as jnp
from jax import lax
from jax.experimental import pallas as pl
from jax.experimental.pallas import tpu as pltpu


# ----------------------------------------------------------------------------
# Fused encoder kernel.  Grid: (n_layers,).  Per grid point the kernel sees
# one layer's weights; the whole batch is processed in a static Python loop
# (RVC inference is B == 1).  x_scr (VMEM (B,T,H) f32) carries the activation
# across the layer axis; the packed output is written only at the last layer.
# ----------------------------------------------------------------------------
def _encoder_fused_kernel(n_heads, kernel_size,
                          lens_ref,                            # SMEM (B,) int32
                          phone_ref, pemb_ref, noise_ref,      # (B,T,E)(B,T,H)(B,T,C)
                          wph_ref, bph_ref,                    # (E,H)bf16 (1,H)f32
                          wqkv_ref, bqkv_ref,                  # (H,3H)bf16 (1,3H)f32
                          wo_ref, bo_ref,                      # (H,H)bf16 (1,H)f32
                          ln1_g_ref, ln1_b_ref,
                          w1_ref, b1_ref, w2_ref, b2_ref,      # (K,H,Fc)/(K,Fc,H) bf16
                          ln2_g_ref, ln2_b_ref,
                          pw_ref, pb_ref,                      # (H,2C)bf16 (1,2C)f32
                          out_ref,                             # (B,T,3C) packed
                          x_scr):                              # VMEM (B,T,H) f32
    l = pl.program_id(0)
    n_layers = pl.num_programs(0)
    B, T, H = x_scr.shape
    nh = n_heads
    d = H // nh
    K = kernel_size
    pad = (K - 1) // 2
    C = out_ref.shape[-1] // 3

    col_iota = lax.broadcasted_iota(jnp.int32, (T, 1), 0)      # (T,1)
    row_iota = lax.broadcasted_iota(jnp.int32, (1, T), 1)      # (1,T)

    # hoist per-layer weight loads (read once per grid step)
    wqkv = wqkv_ref[...]
    bqkv = bqkv_ref[...]
    wo = wo_ref[...]
    bo = bo_ref[...]
    ln1_g, ln1_b = ln1_g_ref[...], ln1_b_ref[...]
    ln2_g, ln2_b = ln2_g_ref[...], ln2_b_ref[...]
    b1, b2 = b1_ref[...], b2_ref[...]

    inv_sqrt_d = 1.0 / math.sqrt(d)
    sqrt_h = math.sqrt(H)

    def add_ln(xa, ya, g, be):                                 # f32 LayerNorm
        z = xa + ya
        mu = jnp.mean(z, axis=-1, keepdims=True)
        var = jnp.mean(jnp.square(z - mu), axis=-1, keepdims=True)
        return (z - mu) * lax.rsqrt(var + 1e-5) * g + be

    def split_heads(t):                                        # (T,H) -> (nh,T,d)
        return jnp.concatenate(
            [t[:, h * d:(h + 1) * d][None, :, :] for h in range(nh)], axis=0)

    def conv_same(xin, w_ref, bias, mask_col):
        # xin (T,Cin) f32, already length-masked. PyTorch Conv1d "same" pad:
        # out[t] = sum_j x[t + j - pad] @ W[j] (out-of-range rows are zero).
        acc = None
        for j in range(K):
            sft = pad - j                                      # xs[t] = x[t - sft]
            if sft == 0:
                xs = xin
            else:
                xs = pltpu.roll(xin, shift=sft % T, axis=0)    # XLU sublane rotate
                if sft > 0:
                    xs = jnp.where(col_iota >= sft, xs, 0.0)   # zero wrapped rows
                else:
                    xs = jnp.where(col_iota < T + sft, xs, 0.0)
            tap = jnp.dot(xs.astype(jnp.bfloat16), w_ref[j],
                          preferred_element_type=jnp.float32)
            acc = tap if acc is None else acc + tap
        return acc + bias

    for b in range(B):                     # static; RVC inference uses B == 1
        lb = lens_ref[b]
        mask_col = (col_iota < lb).astype(jnp.float32)         # (T,1) length mask
        kmask = row_iota < lb                                  # (1,T) key mask

        # ---- layer 0: text embedding (emb_phone + emb_pitch, *sqrt(H), lrelu) ----
        @pl.when(l == 0)
        def _embed():
            x0 = jnp.dot(phone_ref[b].astype(jnp.bfloat16), wph_ref[...],
                         preferred_element_type=jnp.float32) + bph_ref[...]
            x0 = (x0 + pemb_ref[b]) * sqrt_h
            x0 = jnp.where(x0 > 0.0, x0, 0.1 * x0)             # LeakyReLU(0.1)
            x_scr[b] = x0 * mask_col                           # Encoder entry: x * x_mask

        x = x_scr[b]                                           # (T,H) f32
        xb16 = x.astype(jnp.bfloat16)

        # ---- multi-head self-attention (packed QKV, key-only masking) ----
        qkv = jnp.dot(xb16, wqkv, preferred_element_type=jnp.float32) + bqkv
        q = qkv[:, :H] * inv_sqrt_d                            # scale folded into q
        k = qkv[:, H:2 * H]
        v = qkv[:, 2 * H:]

        qh = split_heads(q).astype(jnp.bfloat16)
        kh = split_heads(k).astype(jnp.bfloat16)
        vh = split_heads(v).astype(jnp.bfloat16)

        s = jnp.einsum('hqd,hkd->hqk', qh, kh,
                       preferred_element_type=jnp.float32)     # (nh,T,T) f32
        s = jnp.where(kmask[None, :, :], s, -1e4)              # masked_fill(mask==0,-1e4)
        s = s - jnp.max(s, axis=-1, keepdims=True)
        e = jnp.exp(s)
        p = e * pl.reciprocal(jnp.sum(e, axis=-1, keepdims=True), approx=True)
        ctx = jnp.einsum('hqk,hkd->hqd', p.astype(jnp.bfloat16), vh,
                         preferred_element_type=jnp.float32)
        ctx = jnp.concatenate([ctx[h] for h in range(nh)], axis=-1)   # (T,H)
        y = jnp.dot(ctx.astype(jnp.bfloat16), wo,
                    preferred_element_type=jnp.float32) + bo

        x = add_ln(x, y, ln1_g, ln1_b)

        # ---- conv FFN (tap-accumulated "same" convs) ----
        h1 = jnp.maximum(conv_same(x * mask_col, w1_ref, b1, mask_col), 0.0)
        y2 = conv_same(h1 * mask_col, w2_ref, b2, mask_col) * mask_col

        x = add_ln(x, y2, ln2_g, ln2_b)
        x_scr[b] = x

        # ---- last layer: proj (1x1 conv) -> m/logs, z_p sampling, packed out ----
        @pl.when(l == n_layers - 1)
        def _project():
            xf = (x * mask_col).astype(jnp.bfloat16)           # Encoder output * x_mask
            stats = (jnp.dot(xf, pw_ref[...], preferred_element_type=jnp.float32)
                     + pb_ref[...]) * mask_col                 # (T, 2C)
            m_ = stats[:, :C]
            logs_ = stats[:, C:]
            zp = (m_ + jnp.exp(logs_) * noise_ref[b] * 0.66666) * mask_col
            out_ref[b] = jnp.concatenate([m_, logs_, zp], axis=-1)   # [m | logs | z_p]


# ----------------------------------------------------------------------------
# Parameters (deterministic, synthetic).  Per-layer weights are stacked on a
# leading layer axis.  All matmul weights are bf16; biases / LayerNorm params
# / embeddings are f32.  FFN conv weights are per-tap: (L, K, Cin, Cout) with
# W[l, j] == torch_conv.weight[:, :, j].T.
# ----------------------------------------------------------------------------
def init_params(key, cfg):
    E, H, Fc = cfg['emb_channels'], cfg['hidden_channels'], cfg['filter_channels']
    K, C, L = cfg['kernel_size'], cfg['inter_channels'], cfg['n_layers']
    keys = iter(jax.random.split(key, 16))

    def nrm(shape, dtype=jnp.bfloat16, scale=0.02):
        return (scale * jax.random.normal(next(keys), shape)).astype(dtype)

    z = lambda s: jnp.zeros(s, jnp.float32)
    o = lambda s: jnp.ones(s, jnp.float32)

    return {
        'emb_phone_w': nrm((E, H)), 'emb_phone_b': z((1, H)),
        'emb_pitch': nrm((256, H), jnp.float32),
        'emb_g': nrm((cfg['spk_embed_dim'], cfg['gin_channels']), jnp.float32),
        'wqkv': nrm((L, H, 3 * H)), 'bqkv': z((L, 1, 3 * H)),
        'wo': nrm((L, H, H)), 'bo': z((L, 1, H)),
        'ln1_g': o((L, 1, H)), 'ln1_b': z((L, 1, H)),
        'ffn_w1': nrm((L, K, H, Fc)), 'ffn_b1': z((L, 1, Fc)),
        'ffn_w2': nrm((L, K, Fc, H)), 'ffn_b2': z((L, 1, H)),
        'ln2_g': o((L, 1, H)), 'ln2_b': z((L, 1, H)),
        'proj_w': nrm((H, 2 * C)), 'proj_b': z((1, 2 * C)),
    }


def _pick_vmem_limit():
    # v5e/v6e: 128 MiB VMEM -> allow deeper weight prefetch; v7x: 64 MiB -> 32 MiB.
    try:
        cap = pltpu.get_tpu_info().vmem_capacity_bytes
        return int(min(cap // 2, 96 * 1024 * 1024))
    except Exception:
        return 32 * 1024 * 1024


# ----------------------------------------------------------------------------
# Wrapper: emb_g + enc_p (TextEncoder) + z_p sampling (infer path)
# ----------------------------------------------------------------------------
def synthesizer_enc_p_infer(params, cfg, phone, pitch, phone_lengths, sid, noise):
    B, T, E = phone.shape
    H, C = cfg['hidden_channels'], cfg['inter_channels']
    Fc, K, L = cfg['filter_channels'], cfg['kernel_size'], cfg['n_layers']

    # embedding gathers (glue, not worth a kernel)
    g = jnp.take(params['emb_g'], sid, axis=0)[:, :, None]                 # (B,gin,1)
    pemb = jnp.take(params['emb_pitch'], pitch.astype(jnp.int32), axis=0)  # (B,T,H)
    lens = phone_lengths.astype(jnp.int32)

    def _const(shape):                        # shared (layer invariant), fetched once
        n = len(shape)
        return pl.BlockSpec(shape, lambda ll, lns: (0,) * n)

    def _layer(shape):                        # per-layer, leading dim squeezed
        n = len(shape)
        return pl.BlockSpec((None,) + shape, lambda ll, lns: (ll,) + (0,) * n)

    in_specs = [
        _const((B, T, E)),                    # phone
        _const((B, T, H)),                    # pitch embedding
        _const((B, T, C)),                    # noise
        _const((E, H)), _const((1, H)),       # emb_phone w / b
        _layer((H, 3 * H)), _layer((1, 3 * H)),   # packed QKV w / b
        _layer((H, H)), _layer((1, H)),       # attn out proj w / b
        _layer((1, H)), _layer((1, H)),       # ln1 gamma / beta
        _layer((K, H, Fc)), _layer((1, Fc)),  # ffn conv1 taps w / b
        _layer((K, Fc, H)), _layer((1, H)),   # ffn conv2 taps w / b
        _layer((1, H)), _layer((1, H)),       # ln2 gamma / beta
        _const((H, 2 * C)), _const((1, 2 * C)),   # packed proj (m|logs) w / b
    ]

    packed = pl.pallas_call(
        partial(_encoder_fused_kernel, cfg['n_heads'], K),
        grid_spec=pltpu.PrefetchScalarGridSpec(
            num_scalar_prefetch=1,            # phone_lengths -> SMEM
            grid=(L,),                        # layer axis only; weights DMA'd once
            in_specs=in_specs,
            out_specs=pl.BlockSpec((B, T, 3 * C), lambda ll, lns: (0, 0, 0)),
            scratch_shapes=[pltpu.VMEM((B, T, H), jnp.float32)],
        ),
        out_shape=jax.ShapeDtypeStruct((B, T, 3 * C), jnp.float32),
        compiler_params=pltpu.CompilerParams(
            dimension_semantics=("arbitrary",),
            vmem_limit_bytes=_pick_vmem_limit()),
    )(lens, phone, pemb, noise,
      params['emb_phone_w'], params['emb_phone_b'],
      params['wqkv'], params['bqkv'], params['wo'], params['bo'],
      params['ln1_g'], params['ln1_b'],
      params['ffn_w1'], params['ffn_b1'],
      params['ffn_w2'], params['ffn_b2'],
      params['ln2_g'], params['ln2_b'],
      params['proj_w'], params['proj_b'])

    # unpack the lane-dense (B,T,3C) output and return channels-first tensors
    m_p = jnp.transpose(packed[:, :, :C], (0, 2, 1))          # (B, C, T)
    logs_p = jnp.transpose(packed[:, :, C:2 * C], (0, 2, 1))  # (B, C, T)
    z_p = jnp.transpose(packed[:, :, 2 * C:], (0, 2, 1))      # (B, C, T)

    mask_bt = (jnp.arange(T)[None, :] < lens[:, None]).astype(jnp.float32)
    x_mask = mask_bt[:, None, :]                              # (B, 1, T)

    # TODO(synk): z = flow(z_p, x_mask, g, reverse=True) and o = dec.infer_realtime(...)
    #             require ResidualCouplingBlock / GeneratorNSF sources (not provided).
    return m_p, logs_p, x_mask, z_p, g


# ----------------------------------------------------------------------------
if __name__ == "__main__":
    cfg = dict(inter_channels=16, hidden_channels=32, filter_channels=64,
               emb_channels=32, n_heads=2, n_layers=2, kernel_size=3,
               gin_channels=16, spk_embed_dim=4)
    B, T = 2, 8

    key = jax.random.PRNGKey(0)
    k_phone, k_pitch, k_noise, k_params = jax.random.split(key, 4)

    phone = jax.random.normal(k_phone, (B, T, cfg['emb_channels']), jnp.float32)
    pitch = jax.random.randint(k_pitch, (B, T), 0, 256, jnp.int32)
    phone_lengths = jnp.array([T, T - 2], jnp.int32)
    sid = jnp.array([1, 3], jnp.int32)
    noise = jax.random.normal(k_noise, (B, T, cfg['inter_channels']), jnp.float32)

    params = init_params(k_params, cfg)

    outs = synthesizer_enc_p_infer(params, cfg, phone, pitch, phone_lengths,
                                   sid, noise)
    jax.block_until_ready(outs)
    m_p, logs_p, x_mask, z_p, g = outs
    assert m_p.shape == (B, cfg['inter_channels'], T)
    assert logs_p.shape == (B, cfg['inter_channels'], T)
    assert x_mask.shape == (B, 1, T)
    assert z_p.shape == (B, cfg['inter_channels'], T)
    assert g.shape == (B, cfg['gin_channels'], 1)
    print("KERNEL_OK")
</pallas_src>

<mosaic_0001>
module attributes {stable_mosaic.version = 11 : i64} {
  func.func @_encoder_fused_kernel(%arg0: i32, %arg1: memref<2xi32, #tpu.memory_space<smem>>, %arg2: memref<2x8x32xf32, #tpu.memory_space<vmem>>, %arg3: memref<2x8x32xf32, #tpu.memory_space<vmem>>, %arg4: memref<2x8x16xf32, #tpu.memory_space<vmem>>, %arg5: memref<32x32xbf16, #tpu.memory_space<vmem>>, %arg6: memref<1x32xf32, #tpu.memory_space<vmem>>, %arg7: memref<1x32x96xbf16, #tpu.memory_space<vmem>>, %arg8: memref<1x1x96xf32, #tpu.memory_space<vmem>>, %arg9: memref<1x32x32xbf16, #tpu.memory_space<vmem>>, %arg10: memref<1x1x32xf32, #tpu.memory_space<vmem>>, %arg11: memref<1x1x32xf32, #tpu.memory_space<vmem>>, %arg12: memref<1x1x32xf32, #tpu.memory_space<vmem>>, %arg13: memref<1x3x32x64xbf16, #tpu.memory_space<vmem>>, %arg14: memref<1x1x64xf32, #tpu.memory_space<vmem>>, %arg15: memref<1x3x64x32xbf16, #tpu.memory_space<vmem>>, %arg16: memref<1x1x32xf32, #tpu.memory_space<vmem>>, %arg17: memref<1x1x32xf32, #tpu.memory_space<vmem>>, %arg18: memref<1x1x32xf32, #tpu.memory_space<vmem>>, %arg19: memref<32x32xbf16, #tpu.memory_space<vmem>>, %arg20: memref<1x32xf32, #tpu.memory_space<vmem>>, %arg21: memref<2x8x48xf32, #tpu.memory_space<vmem>>, %arg22: memref<2x8x32xf32, #tpu.memory_space<vmem>>) attributes {dimension_semantics = [#tpu.dimension_semantics<arbitrary>], iteration_bounds = array<i64: 2>, scalar_prefetch = 1 : i64, scratch_operands = 1 : i64, tpu.core_type = #tpu.core_type<tc>, window_params = [{pipeline_mode = #tpu.pipeline_mode<synchronous>, transform_indices = @transform_0, window_bounds = array<i64: 2, 8, 32>}, {pipeline_mode = #tpu.pipeline_mode<synchronous>, transform_indices = @transform_1, window_bounds = array<i64: 2, 8, 32>}, {pipeline_mode = #tpu.pipeline_mode<synchronous>, transform_indices = @transform_2, window_bounds = array<i64: 2, 8, 16>}, {pipeline_mode = #tpu.pipeline_mode<synchronous>, transform_indices = @transform_3, window_bounds = array<i64: 32, 32>}, {pipeline_mode = #tpu.pipeline_mode<synchronous>, transform_indices = @transform_4, window_bounds = array<i64: 1, 32>}, {transform_indices = @transform_5, window_bounds = array<i64: 1, 32, 96>}, {transform_indices = @transform_6, window_bounds = array<i64: 1, 1, 96>}, {transform_indices = @transform_7, window_bounds = array<i64: 1, 32, 32>}, {transform_indices = @transform_8, window_bounds = array<i64: 1, 1, 32>}, {transform_indices = @transform_9, window_bounds = array<i64: 1, 1, 32>}, {transform_indices = @transform_10, window_bounds = array<i64: 1, 1, 32>}, {transform_indices = @transform_11, window_bounds = array<i64: 1, 3, 32, 64>}, {transform_indices = @transform_12, window_bounds = array<i64: 1, 1, 64>}, {transform_indices = @transform_13, window_bounds = array<i64: 1, 3, 64, 32>}, {transform_indices = @transform_14, window_bounds = array<i64: 1, 1, 32>}, {transform_indices = @transform_15, window_bounds = array<i64: 1, 1, 32>}, {transform_indices = @transform_16, window_bounds = array<i64: 1, 1, 32>}, {pipeline_mode = #tpu.pipeline_mode<synchronous>, transform_indices = @transform_17, window_bounds = array<i64: 32, 32>}, {pipeline_mode = #tpu.pipeline_mode<synchronous>, transform_indices = @transform_18, window_bounds = array<i64: 1, 32>}, {pipeline_mode = #tpu.pipeline_mode<synchronous>, transform_indices = @transform_19, window_bounds = array<i64: 2, 8, 48>}]} {
    %0 = tpu.iota {dimensions = array<i32: 0>} : vector<8x1xi32>
    %1 = tpu.iota {dimensions = array<i32: 1>} : vector<1x8xi32>
    %c0 = arith.constant 0 : index
    %c0_0 = arith.constant 0 : index
    %c0_1 = arith.constant 0 : index
    %2 = vector.load %arg7[%c0, %c0_0, %c0_1] : memref<1x32x96xbf16, #tpu.memory_space<vmem>>, vector<1x32x96xbf16>
    %3 = vector.shape_cast %2 : vector<1x32x96xbf16> to vector<32x96xbf16>
    %c0_2 = arith.constant 0 : index
    %c0_3 = arith.constant 0 : index
    %c0_4 = arith.constant 0 : index
    %4 = vector.load %arg8[%c0_2, %c0_3, %c0_4] : memref<1x1x96xf32, #tpu.memory_space<vmem>>, vector<1x1x96xf32>
    %5 = vector.shape_cast %4 : vector<1x1x96xf32> to vector<1x96xf32>
    %c0_5 = arith.constant 0 : index
    %c0_6 = arith.constant 0 : index
    %c0_7 = arith.constant 0 : index
    %6 = vector.load %arg9[%c0_5, %c0_6, %c0_7] : memref<1x32x32xbf16, #tpu.memory_space<vmem>>, vector<1x32x32xbf16>
    %7 = vector.shape_cast %6 : vector<1x32x32xbf16> to vector<32x32xbf16>
    %c0_8 = arith.constant 0 : index
    %c0_9 = arith.constant 0 : index
    %c0_10 = arith.constant 0 : index
    %8 = vector.load %arg10[%c0_8, %c0_9, %c0_10] : memref<1x1x32xf32, #tpu.memory_space<vmem>>, vector<1x1x32xf32>
    %9 = vector.shape_cast %8 : vector<1x1x32xf32> to vector<1x32xf32>
    %c0_11 = arith.constant 0 : index
    %c0_12 = arith.constant 0 : index
    %c0_13 = arith.constant 0 : index
    %10 = vector.load %arg11[%c0_11, %c0_12, %c0_13] : memref<1x1x32xf32, #tpu.memory_space<vmem>>, vector<1x1x32xf32>
    %11 = vector.shape_cast %10 : vector<1x1x32xf32> to vector<1x32xf32>
    %c0_14 = arith.constant 0 : index
    %c0_15 = arith.constant 0 : index
    %c0_16 = arith.constant 0 : index
    %12 = vector.load %arg12[%c0_14, %c0_15, %c0_16] : memref<1x1x32xf32, #tpu.memory_space<vmem>>, vector<1x1x32xf32>
    %13 = vector.shape_cast %12 : vector<1x1x32xf32> to vector<1x32xf32>
    %c0_17 = arith.constant 0 : index
    %c0_18 = arith.constant 0 : index
    %c0_19 = arith.constant 0 : index
    %14 = vector.load %arg17[%c0_17, %c0_18, %c0_19] : memref<1x1x32xf32, #tpu.memory_space<vmem>>, vector<1x1x32xf32>
    %15 = vector.shape_cast %14 : vector<1x1x32xf32> to vector<1x32xf32>
    %c0_20 = arith.constant 0 : index
    %c0_21 = arith.constant 0 : index
    %c0_22 = arith.constant 0 : index
    %16 = vector.load %arg18[%c0_20, %c0_21, %c0_22] : memref<1x1x32xf32, #tpu.memory_space<vmem>>, vector<1x1x32xf32>
    %17 = vector.shape_cast %16 : vector<1x1x32xf32> to vector<1x32xf32>
    %c0_23 = arith.constant 0 : index
    %c0_24 = arith.constant 0 : index
    %c0_25 = arith.constant 0 : index
    %18 = vector.load %arg14[%c0_23, %c0_24, %c0_25] : memref<1x1x64xf32, #tpu.memory_space<vmem>>, vector<1x1x64xf32>
    %19 = vector.shape_cast %18 : vector<1x1x64xf32> to vector<1x64xf32>
    %c0_26 = arith.constant 0 : index
    %c0_27 = arith.constant 0 : index
    %c0_28 = arith.constant 0 : index
    %20 = vector.load %arg16[%c0_26, %c0_27, %c0_28] : memref<1x1x32xf32, #tpu.memory_space<vmem>>, vector<1x1x32xf32>
    %21 = vector.shape_cast %20 : vector<1x1x32xf32> to vector<1x32xf32>
    %c0_29 = arith.constant 0 : index
    %22 = memref.load %arg1[%c0_29] : memref<2xi32, #tpu.memory_space<smem>>
    %23 = vector.broadcast %22 : i32 to vector<8x1xi32>
    %24 = arith.cmpi slt, %0, %23 : vector<8x1xi32>
    %25 = arith.extui %24 : vector<8x1xi1> to vector<8x1xi32>
    %26 = arith.sitofp %25 : vector<8x1xi32> to vector<8x1xf32>
    %27 = vector.broadcast %22 : i32 to vector<1x8xi32>
    %28 = arith.cmpi slt, %1, %27 : vector<1x8xi32>
    %c0_i32 = arith.constant 0 : i32
    %29 = arith.cmpi eq, %arg0, %c0_i32 : i32
    %30 = arith.extui %29 : i1 to i32
    %c0_i32_30 = arith.constant 0 : i32
    %31 = arith.cmpi ne, %30, %c0_i32_30 : i32
    scf.if %31 {
      %c0_167 = arith.constant 0 : index
      %c0_168 = arith.constant 0 : index
      %c0_169 = arith.constant 0 : index
      %394 = vector.load %arg2[%c0_167, %c0_168, %c0_169] : memref<2x8x32xf32, #tpu.memory_space<vmem>>, vector<1x8x32xf32>
      %395 = vector.shape_cast %394 : vector<1x8x32xf32> to vector<8x32xf32>
      %396 = arith.truncf %395 : vector<8x32xf32> to vector<8x32xbf16>
      %c0_170 = arith.constant 0 : index
      %c0_171 = arith.constant 0 : index
      %397 = vector.load %arg5[%c0_170, %c0_171] : memref<32x32xbf16, #tpu.memory_space<vmem>>, vector<32x32xbf16>
      %cst_172 = arith.constant dense<0.000000e+00> : vector<8x32xf32>
      %398 = tpu.matmul %396, %397, %cst_172 {dimension_numbers = #tpu.dot_dimension_numbers<[1], [0], [0], [1], [0, 0, 1, 1], [], []>} : vector<8x32xbf16>, vector<32x32xbf16>, vector<8x32xf32> -> vector<8x32xf32>
      %c0_173 = arith.constant 0 : index
      %c0_174 = arith.constant 0 : index
      %399 = vector.load %arg6[%c0_173, %c0_174] : memref<1x32xf32, #tpu.memory_space<vmem>>, vector<1x32xf32>
      %400 = vector.broadcast %399 : vector<1x32xf32> to vector<8x32xf32>
      %401 = arith.addf %398, %400 : vector<8x32xf32>
      %c0_175 = arith.constant 0 : index
      %c0_176 = arith.constant 0 : index
      %c0_177 = arith.constant 0 : index
      %402 = vector.load %arg3[%c0_175, %c0_176, %c0_177] : memref<2x8x32xf32, #tpu.memory_space<vmem>>, vector<1x8x32xf32>
      %403 = vector.shape_cast %402 : vector<1x8x32xf32> to vector<8x32xf32>
      %404 = arith.addf %401, %403 : vector<8x32xf32>
      %cst_178 = arith.constant 5.65685415 : f32
      %405 = vector.broadcast %cst_178 : f32 to vector<8x32xf32>
      %406 = arith.mulf %404, %405 : vector<8x32xf32>
      %cst_179 = arith.constant 0.000000e+00 : f32
      %407 = vector.broadcast %cst_179 : f32 to vector<8x32xf32>
      %408 = arith.cmpf ogt, %406, %407 : vector<8x32xf32>
      %cst_180 = arith.constant 1.000000e-01 : f32
      %409 = vector.broadcast %cst_180 : f32 to vector<8x32xf32>
      %410 = arith.mulf %409, %406 : vector<8x32xf32>
      %411 = arith.select %408, %406, %410 : vector<8x32xi1>, vector<8x32xf32>
      %412 = vector.broadcast %26 : vector<8x1xf32> to vector<8x32xf32>
      %413 = arith.mulf %411, %412 : vector<8x32xf32>
      %c0_181 = arith.constant 0 : index
      %c0_182 = arith.constant 0 : index
      %c0_183 = arith.constant 0 : index
      %414 = vector.load %arg22[%c0_181, %c0_182, %c0_183] : memref<2x8x32xf32, #tpu.memory_space<vmem>>, vector<1x8x32xf32>
      %415 = vector.shape_cast %414 : vector<1x8x32xf32> to vector<8x32xf32>
      %416 = vector.shape_cast %413 : vector<8x32xf32> to vector<1x8x32xf32>
      tpu.vector_store %arg22[%c0_181, %c0_182, %c0_183], %416 {strides = array<i32>} : memref<2x8x32xf32, #tpu.memory_space<vmem>>, vector<1x8x32xf32>,
    } else {
    }
    %c0_31 = arith.constant 0 : index
    %c0_32 = arith.constant 0 : index
    %c0_33 = arith.constant 0 : index
    %32 = vector.load %arg22[%c0_31, %c0_32, %c0_33] : memref<2x8x32xf32, #tpu.memory_space<vmem>>, vector<1x8x32xf32>
    %33 = vector.shape_cast %32 : vector<1x8x32xf32> to vector<8x32xf32>
    %34 = arith.truncf %33 : vector<8x32xf32> to vector<8x32xbf16>
    %cst = arith.constant dense<0.000000e+00> : vector<8x96xf32>
    %35 = tpu.matmul %34, %3, %cst {dimension_numbers = #tpu.dot_dimension_numbers<[1], [0], [0], [1], [0, 0, 1, 1], [], []>} : vector<8x32xbf16>, vector<32x96xbf16>, vector<8x96xf32> -> vector<8x96xf32>
    %36 = vector.broadcast %5 : vector<1x96xf32> to vector<8x96xf32>
    %37 = arith.addf %35, %36 : vector<8x96xf32>
    %38 = vector.extract_strided_slice %37 {offsets = [0, 0], sizes = [8, 32], strides = [1, 1]} : vector<8x96xf32> to vector<8x32xf32>
    %cst_34 = arith.constant 2.500000e-01 : f32
    %39 = vector.broadcast %cst_34 : f32 to vector<8x32xf32>
    %40 = arith.mulf %38, %39 : vector<8x32xf32>
    %41 = vector.extract_strided_slice %37 {offsets = [0, 32], sizes = [8, 32], strides = [1, 1]} : vector<8x96xf32> to vector<8x32xf32>
    %42 = vector.extract_strided_slice %37 {offsets = [0, 64], sizes = [8, 32], strides = [1, 1]} : vector<8x96xf32> to vector<8x32xf32>
    %43 = vector.extract_strided_slice %40 {offsets = [0, 0], sizes = [8, 16], strides = [1, 1]} : vector<8x32xf32> to vector<8x16xf32>
    %44 = vector.shape_cast %43 : vector<8x16xf32> to vector<1x8x16xf32>
    %45 = vector.extract_strided_slice %40 {offsets = [0, 16], sizes = [8, 16], strides = [1, 1]} : vector<8x32xf32> to vector<8x16xf32>
    %46 = vector.shape_cast %45 : vector<8x16xf32> to vector<1x8x16xf32>
    %47 = tpu.concatenate %44, %46 in 0 : vector<1x8x16xf32>, vector<1x8x16xf32> -> vector<2x8x16xf32>
    %48 = arith.truncf %47 : vector<2x8x16xf32> to vector<2x8x16xbf16>
    %49 = vector.extract_strided_slice %41 {offsets = [0, 0], sizes = [8, 16], strides = [1, 1]} : vector<8x32xf32> to vector<8x16xf32>
    %50 = vector.shape_cast %49 : vector<8x16xf32> to vector<1x8x16xf32>
    %51 = vector.extract_strided_slice %41 {offsets = [0, 16], sizes = [8, 16], strides = [1, 1]} : vector<8x32xf32> to vector<8x16xf32>
    %52 = vector.shape_cast %51 : vector<8x16xf32> to vector<1x8x16xf32>
    %53 = tpu.concatenate %50, %52 in 0 : vector<1x8x16xf32>, vector<1x8x16xf32> -> vector<2x8x16xf32>
    %54 = arith.truncf %53 : vector<2x8x16xf32> to vector<2x8x16xbf16>
    %55 = vector.extract_strided_slice %42 {offsets = [0, 0], sizes = [8, 16], strides = [1, 1]} : vector<8x32xf32> to vector<8x16xf32>
    %56 = vector.shape_cast %55 : vector<8x16xf32> to vector<1x8x16xf32>
    %57 = vector.extract_strided_slice %42 {offsets = [0, 16], sizes = [8, 16], strides = [1, 1]} : vector<8x32xf32> to vector<8x16xf32>
    %58 = vector.shape_cast %57 : vector<8x16xf32> to vector<1x8x16xf32>
    %59 = tpu.concatenate %56, %58 in 0 : vector<1x8x16xf32>, vector<1x8x16xf32> -> vector<2x8x16xf32>
    %60 = arith.truncf %59 : vector<2x8x16xf32> to vector<2x8x16xbf16>
    "tpu.trace_start"() <{level = 10 : i32, message = "hqd,hkd->hqk"}> : () -> ()
    %cst_35 = arith.constant dense<0.000000e+00> : vector<2x8x8xf32>
    %61 = tpu.matmul %48, %54, %cst_35 {dimension_numbers = #tpu.dot_dimension_numbers<[2], [2], [1], [1], [0, 0, 0, 1, 1, 1], [0], [0]>} : vector<2x8x16xbf16>, vector<2x8x16xbf16>, vector<2x8x8xf32> -> vector<2x8x8xf32>
    "tpu.trace_stop"() : () -> ()
    %62 = vector.shape_cast %28 : vector<1x8xi1> to vector<1x1x8xi1>
    %cst_36 = arith.constant -1.000000e+04 : f32
    %63 = vector.shape_cast %62 : vector<1x1x8xi1> to vector<1x1x8xi1>
    %64 = vector.broadcast %63 : vector<1x1x8xi1> to vector<2x8x8xi1>
    %65 = vector.broadcast %cst_36 : f32 to vector<2x8x8xf32>
    %66 = arith.select %64, %61, %65 : vector<2x8x8xi1>, vector<2x8x8xf32>
    %cst_37 = arith.constant dense<0xFF800000> : vector<2x8xf32>
    %67 = vector.multi_reduction <maximumf>, %66, %cst_37 [2] : vector<2x8x8xf32> to vector<2x8xf32>
    %68 = vector.shape_cast %67 : vector<2x8xf32> to vector<2x8x1xf32>
    %69 = vector.broadcast %68 : vector<2x8x1xf32> to vector<2x8x8xf32>
    %70 = arith.subf %66, %69 : vector<2x8x8xf32>
    %71 = math.exp %70 : vector<2x8x8xf32>
    %cst_38 = arith.constant dense<0.000000e+00> : vector<2x8xf32>
    %72 = vector.multi_reduction <add>, %71, %cst_38 [2] : vector<2x8x8xf32> to vector<2x8xf32>
    %73 = vector.shape_cast %72 : vector<2x8xf32> to vector<2x8x1xf32>
    %74 = tpu.reciprocal %73 {approx = true} : vector<2x8x1xf32> -> vector<2x8x1xf32>
    %75 = vector.broadcast %74 : vector<2x8x1xf32> to vector<2x8x8xf32>
    %76 = arith.mulf %71, %75 : vector<2x8x8xf32>
    %77 = arith.truncf %76 : vector<2x8x8xf32> to vector<2x8x8xbf16>
    "tpu.trace_start"() <{level = 10 : i32, message = "hqk,hkd->hqd"}> : () -> ()
    %cst_39 = arith.constant dense<0.000000e+00> : vector<2x8x16xf32>
    %78 = tpu.matmul %77, %60, %cst_39 {dimension_numbers = #tpu.dot_dimension_numbers<[2], [1], [1], [2], [0, 0, 0, 1, 1, 2], [0], [0]>} : vector<2x8x8xbf16>, vector<2x8x16xbf16>, vector<2x8x16xf32> -> vector<2x8x16xf32>
    "tpu.trace_stop"() : () -> ()
    %79 = vector.extract_strided_slice %78 {offsets = [0, 0, 0], sizes = [1, 8, 16], strides = [1, 1, 1]} : vector<2x8x16xf32> to vector<1x8x16xf32>
    %80 = vector.shape_cast %79 : vector<1x8x16xf32> to vector<8x16xf32>
    %81 = vector.extract_strided_slice %78 {offsets = [1, 0, 0], sizes = [1, 8, 16], strides = [1, 1, 1]} : vector<2x8x16xf32> to vector<1x8x16xf32>
    %82 = vector.shape_cast %81 : vector<1x8x16xf32> to vector<8x16xf32>
    %83 = tpu.concatenate %80, %82 in 1 : vector<8x16xf32>, vector<8x16xf32> -> vector<8x32xf32>
    %84 = arith.truncf %83 : vector<8x32xf32> to vector<8x32xbf16>
    %cst_40 = arith.constant dense<0.000000e+00> : vector<8x32xf32>
    %85 = tpu.matmul %84, %7, %cst_40 {dimension_numbers = #tpu.dot_dimension_numbers<[1], [0], [0], [1], [0, 0, 1, 1], [], []>} : vector<8x32xbf16>, vector<32x32xbf16>, vector<8x32xf32> -> vector<8x32xf32>
    %86 = vector.broadcast %9 : vector<1x32xf32> to vector<8x32xf32>
    %87 = arith.addf %85, %86 : vector<8x32xf32>
    %88 = arith.addf %33, %87 : vector<8x32xf32>
    %cst_41 = arith.constant dense<0.000000e+00> : vector<8xf32>
    %89 = vector.multi_reduction <add>, %88, %cst_41 [1] : vector<8x32xf32> to vector<8xf32>
    %90 = vector.shape_cast %89 : vector<8xf32> to vector<8x1xf32>
    %cst_42 = arith.constant 3.200000e+01 : f32
    %91 = vector.broadcast %cst_42 : f32 to vector<8x1xf32>
    %92 = arith.divf %90, %91 : vector<8x1xf32>
    %93 = vector.broadcast %92 : vector<8x1xf32> to vector<8x32xf32>
    %94 = arith.subf %88, %93 : vector<8x32xf32>
    %95 = arith.mulf %94, %94 : vector<8x32xf32>
    %cst_43 = arith.constant dense<0.000000e+00> : vector<8xf32>
    %96 = vector.multi_reduction <add>, %95, %cst_43 [1] : vector<8x32xf32> to vector<8xf32>
    %97 = vector.shape_cast %96 : vector<8xf32> to vector<8x1xf32>
    %cst_44 = arith.constant 3.200000e+01 : f32
    %98 = vector.broadcast %cst_44 : f32 to vector<8x1xf32>
    %99 = arith.divf %97, %98 : vector<8x1xf32>
    %100 = vector.broadcast %92 : vector<8x1xf32> to vector<8x32xf32>
    %101 = arith.subf %88, %100 : vector<8x32xf32>
    %cst_45 = arith.constant 9.99999974E-6 : f32
    %102 = vector.broadcast %cst_45 : f32 to vector<8x1xf32>
    %103 = arith.addf %99, %102 : vector<8x1xf32>
    %104 = math.rsqrt %103 : vector<8x1xf32>
    %105 = vector.broadcast %104 : vector<8x1xf32> to vector<8x32xf32>
    %106 = arith.mulf %101, %105 : vector<8x32xf32>
    %107 = vector.broadcast %11 : vector<1x32xf32> to vector<8x32xf32>
    %108 = arith.mulf %106, %107 : vector<8x32xf32>
    %109 = vector.broadcast %13 : vector<1x32xf32> to vector<8x32xf32>
    %110 = arith.addf %108, %109 : vector<8x32xf32>
    %111 = vector.broadcast %26 : vector<8x1xf32> to vector<8x32xf32>
    %112 = arith.mulf %110, %111 : vector<8x32xf32>
    %c1_i32 = arith.constant 1 : i32
    %113 = tpu.dynamic_rotate %112 by %c1_i32 dim 0 : vector<8x32xf32>, i32 -> vector<8x32xf32>
    %c1_i32_46 = arith.constant 1 : i32
    %114 = vector.broadcast %c1_i32_46 : i32 to vector<8x1xi32>
    %115 = arith.cmpi sge, %0, %114 : vector<8x1xi32>
    %cst_47 = arith.constant 0.000000e+00 : f32
    %116 = vector.shape_cast %115 : vector<8x1xi1> to vector<8x1xi1>
    %117 = vector.broadcast %116 : vector<8x1xi1> to vector<8x32xi1>
    %118 = vector.broadcast %cst_47 : f32 to vector<8x32xf32>
    %119 = arith.select %117, %113, %118 : vector<8x32xi1>, vector<8x32xf32>
    %120 = arith.truncf %119 : vector<8x32xf32> to vector<8x32xbf16>
    %c0_48 = arith.constant 0 : index
    %c0_49 = arith.constant 0 : index
    %c0_50 = arith.constant 0 : index
    %c0_51 = arith.constant 0 : index
    %121 = vector.load %arg13[%c0_48, %c0_49, %c0_50, %c0_51] : memref<1x3x32x64xbf16, #tpu.memory_space<vmem>>, vector<1x1x32x64xbf16>
    %122 = vector.shape_cast %121 : vector<1x1x32x64xbf16> to vector<32x64xbf16>
    %cst_52 = arith.constant dense<0.000000e+00> : vector<8x64xf32>
    %123 = tpu.matmul %120, %122, %cst_52 {dimension_numbers = #tpu.dot_dimension_numbers<[1], [0], [0], [1], [0, 0, 1, 1], [], []>} : vector<8x32xbf16>, vector<32x64xbf16>, vector<8x64xf32> -> vector<8x64xf32>
    %124 = arith.truncf %112 : vector<8x32xf32> to vector<8x32xbf16>
    %c0_53 = arith.constant 0 : index
    %c1 = arith.constant 1 : index
    %c0_54 = arith.constant 0 : index
    %c0_55 = arith.constant 0 : index
    %125 = vector.load %arg13[%c0_53, %c1, %c0_54, %c0_55] : memref<1x3x32x64xbf16, #tpu.memory_space<vmem>>, vector<1x1x32x64xbf16>
    %126 = vector.shape_cast %125 : vector<1x1x32x64xbf16> to vector<32x64xbf16>
    %cst_56 = arith.constant dense<0.000000e+00> : vector<8x64xf32>
    %127 = tpu.matmul %124, %126, %cst_56 {dimension_numbers = #tpu.dot_dimension_numbers<[1], [0], [0], [1], [0, 0, 1, 1], [], []>} : vector<8x32xbf16>, vector<32x64xbf16>, vector<8x64xf32> -> vector<8x64xf32>
    %128 = arith.addf %123, %127 : vector<8x64xf32>
    %c7_i32 = arith.constant 7 : i32
    %129 = tpu.dynamic_rotate %112 by %c7_i32 dim 0 : vector<8x32xf32>, i32 -> vector<8x32xf32>
    %c7_i32_57 = arith.constant 7 : i32
    %130 = vector.broadcast %c7_i32_57 : i32 to vector<8x1xi32>
    %131 = arith.cmpi slt, %0, %130 : vector<8x1xi32>
    %cst_58 = arith.constant 0.000000e+00 : f32
    %132 = vector.shape_cast %131 : vector<8x1xi1> to vector<8x1xi1>
    %133 = vector.broadcast %132 : vector<8x1xi1> to vector<8x32xi1>
    %134 = vector.broadcast %cst_58 : f32 to vector<8x32xf32>
    %135 = arith.select %133, %129, %134 : vector<8x32xi1>, vector<8x32xf32>
    %136 = arith.truncf %135 : vector<8x32xf32> to vector<8x32xbf16>
    %c0_59 = arith.constant 0 : index
    %c2 = arith.constant 2 : index
    %c0_60 = arith.constant 0 : index
    %c0_61 = arith.constant 0 : index
    %137 = vector.load %arg13[%c0_59, %c2, %c0_60, %c0_61] : memref<1x3x32x64xbf16, #tpu.memory_space<vmem>>, vector<1x1x32x64xbf16>
    %138 = vector.shape_cast %137 : vector<1x1x32x64xbf16> to vector<32x64xbf16>
    %cst_62 = arith.constant dense<0.000000e+00> : vector<8x64xf32>
    %139 = tpu.matmul %136, %138, %cst_62 {dimension_numbers = #tpu.dot_dimension_numbers<[1], [0], [0], [1], [0, 0, 1, 1], [], []>} : vector<8x32xbf16>, vector<32x64xbf16>, vector<8x64xf32> -> vector<8x64xf32>
    %140 = arith.addf %128, %139 : vector<8x64xf32>
    %141 = vector.broadcast %19 : vector<1x64xf32> to vector<8x64xf32>
    %142 = arith.addf %140, %141 : vector<8x64xf32>
    %cst_63 = arith.constant 0.000000e+00 : f32
    %143 = vector.broadcast %cst_63 : f32 to vector<8x64xf32>
    %144 = arith.maximumf %142, %143 : vector<8x64xf32>
    %145 = vector.broadcast %26 : vector<8x1xf32> to vector<8x64xf32>
    %146 = arith.mulf %144, %145 : vector<8x64xf32>
    %c1_i32_64 = arith.constant 1 : i32
    %147 = tpu.dynamic_rotate %146 by %c1_i32_64 dim 0 : vector<8x64xf32>, i32 -> vector<8x64xf32>
    %c1_i32_65 = arith.constant 1 : i32
    %148 = vector.broadcast %c1_i32_65 : i32 to vector<8x1xi32>
    %149 = arith.cmpi sge, %0, %148 : vector<8x1xi32>
    %cst_66 = arith.constant 0.000000e+00 : f32
    %150 = vector.shape_cast %149 : vector<8x1xi1> to vector<8x1xi1>
    %151 = vector.broadcast %150 : vector<8x1xi1> to vector<8x64xi1>
    %152 = vector.broadcast %cst_66 : f32 to vector<8x64xf32>
    %153 = arith.select %151, %147, %152 : vector<8x64xi1>, vector<8x64xf32>
    %154 = arith.truncf %153 : vector<8x64xf32> to vector<8x64xbf16>
    %c0_67 = arith.constant 0 : index
    %c0_68 = arith.constant 0 : index
    %c0_69 = arith.constant 0 : index
    %c0_70 = arith.constant 0 : index
    %155 = vector.load %arg15[%c0_67, %c0_68, %c0_69, %c0_70] : memref<1x3x64x32xbf16, #tpu.memory_space<vmem>>, vector<1x1x64x32xbf16>
    %156 = vector.shape_cast %155 : vector<1x1x64x32xbf16> to vector<64x32xbf16>
    %cst_71 = arith.constant dense<0.000000e+00> : vector<8x32xf32>
    %157 = tpu.matmul %154, %156, %cst_71 {dimension_numbers = #tpu.dot_dimension_numbers<[1], [0], [0], [1], [0, 0, 1, 1], [], []>} : vector<8x64xbf16>, vector<64x32xbf16>, vector<8x32xf32> -> vector<8x32xf32>
    %158 = arith.truncf %146 : vector<8x64xf32> to vector<8x64xbf16>
    %c0_72 = arith.constant 0 : index
    %c1_73 = arith.constant 1 : index
    %c0_74 = arith.constant 0 : index
    %c0_75 = arith.constant 0 : index
    %159 = vector.load %arg15[%c0_72, %c1_73, %c0_74, %c0_75] : memref<1x3x64x32xbf16, #tpu.memory_space<vmem>>, vector<1x1x64x32xbf16>
    %160 = vector.shape_cast %159 : vector<1x1x64x32xbf16> to vector<64x32xbf16>
    %cst_76 = arith.constant dense<0.000000e+00> : vector<8x32xf32>
    %161 = tpu.matmul %158, %160, %cst_76 {dimension_numbers = #tpu.dot_dimension_numbers<[1], [0], [0], [1], [0, 0, 1, 1], [], []>} : vector<8x64xbf16>, vector<64x32xbf16>, vector<8x32xf32> -> vector<8x32xf32>
    %162 = arith.addf %157, %161 : vector<8x32xf32>
    %c7_i32_77 = arith.constant 7 : i32
    %163 = tpu.dynamic_rotate %146 by %c7_i32_77 dim 0 : vector<8x64xf32>, i32 -> vector<8x64xf32>
    %c7_i32_78 = arith.constant 7 : i32
    %164 = vector.broadcast %c7_i32_78 : i32 to vector<8x1xi32>
    %165 = arith.cmpi slt, %0, %164 : vector<8x1xi32>
    %cst_79 = arith.constant 0.000000e+00 : f32
    %166 = vector.shape_cast %165 : vector<8x1xi1> to vector<8x1xi1>
    %167 = vector.broadcast %166 : vector<8x1xi1> to vector<8x64xi1>
    %168 = vector.broadcast %cst_79 : f32 to vector<8x64xf32>
    %169 = arith.select %167, %163, %168 : vector<8x64xi1>, vector<8x64xf32>
    %170 = arith.truncf %169 : vector<8x64xf32> to vector<8x64xbf16>
    %c0_80 = arith.constant 0 : index
    %c2_81 = arith.constant 2 : index
    %c0_82 = arith.constant 0 : index
    %c0_83 = arith.constant 0 : index
    %171 = vector.load %arg15[%c0_80, %c2_81, %c0_82, %c0_83] : memref<1x3x64x32xbf16, #tpu.memory_space<vmem>>, vector<1x1x64x32xbf16>
    %172 = vector.shape_cast %171 : vector<1x1x64x32xbf16> to vector<64x32xbf16>
    %cst_84 = arith.constant dense<0.000000e+00> : vector<8x32xf32>
    %173 = tpu.matmul %170, %172, %cst_84 {dimension_numbers = #tpu.dot_dimension_numbers<[1], [0], [0], [1], [0, 0, 1, 1], [], []>} : vector<8x64xbf16>, vector<64x32xbf16>, vector<8x32xf32> -> vector<8x32xf32>
    %174 = arith.addf %162, %173 : vector<8x32xf32>
    %175 = vector.broadcast %21 : vector<1x32xf32> to vector<8x32xf32>
    %176 = arith.addf %174, %175 : vector<8x32xf32>
    %177 = vector.broadcast %26 : vector<8x1xf32> to vector<8x32xf32>
    %178 = arith.mulf %176, %177 : vector<8x32xf32>
    %179 = arith.addf %110, %178 : vector<8x32xf32>
    %cst_85 = arith.constant dense<0.000000e+00> : vector<8xf32>
    %180 = vector.multi_reduction <add>, %179, %cst_85 [1] : vector<8x32xf32> to vector<8xf32>
    %181 = vector.shape_cast %180 : vector<8xf32> to vector<8x1xf32>
    %cst_86 = arith.constant 3.200000e+01 : f32
    %182 = vector.broadcast %cst_86 : f32 to vector<8x1xf32>
    %183 = arith.divf %181, %182 : vector<8x1xf32>
    %184 = vector.broadcast %183 : vector<8x1xf32> to vector<8x32xf32>
    %185 = arith.subf %179, %184 : vector<8x32xf32>
    %186 = arith.mulf %185, %185 : vector<8x32xf32>
    %cst_87 = arith.constant dense<0.000000e+00> : vector<8xf32>
    %187 = vector.multi_reduction <add>, %186, %cst_87 [1] : vector<8x32xf32> to vector<8xf32>
    %188 = vector.shape_cast %187 : vector<8xf32> to vector<8x1xf32>
    %cst_88 = arith.constant 3.200000e+01 : f32
    %189 = vector.broadcast %cst_88 : f32 to vector<8x1xf32>
    %190 = arith.divf %188, %189 : vector<8x1xf32>
    %191 = vector.broadcast %183 : vector<8x1xf32> to vector<8x32xf32>
    %192 = arith.subf %179, %191 : vector<8x32xf32>
    %cst_89 = arith.constant 9.99999974E-6 : f32
    %193 = vector.broadcast %cst_89 : f32 to vector<8x1xf32>
    %194 = arith.addf %190, %193 : vector<8x1xf32>
    %195 = math.rsqrt %194 : vector<8x1xf32>
    %196 = vector.broadcast %195 : vector<8x1xf32> to vector<8x32xf32>
    %197 = arith.mulf %192, %196 : vector<8x32xf32>
    %198 = vector.broadcast %15 : vector<1x32xf32> to vector<8x32xf32>
    %199 = arith.mulf %197, %198 : vector<8x32xf32>
    %200 = vector.broadcast %17 : vector<1x32xf32> to vector<8x32xf32>
    %201 = arith.addf %199, %200 : vector<8x32xf32>
    %c0_90 = arith.constant 0 : index
    %c0_91 = arith.constant 0 : index
    %c0_92 = arith.constant 0 : index
    %202 = vector.load %arg22[%c0_90, %c0_91, %c0_92] : memref<2x8x32xf32, #tpu.memory_space<vmem>>, vector<1x8x32xf32>
    %203 = vector.shape_cast %202 : vector<1x8x32xf32> to vector<8x32xf32>
    %204 = vector.shape_cast %201 : vector<8x32xf32> to vector<1x8x32xf32>
    tpu.vector_store %arg22[%c0_90, %c0_91, %c0_92], %204 {strides = array<i32>} : memref<2x8x32xf32, #tpu.memory_space<vmem>>, vector<1x8x32xf32>,
    %c1_i32_93 = arith.constant 1 : i32
    %205 = arith.cmpi eq, %arg0, %c1_i32_93 : i32
    %206 = arith.extui %205 : i1 to i32
    %c0_i32_94 = arith.constant 0 : i32
    %207 = arith.cmpi ne, %206, %c0_i32_94 : i32
    scf.if %207 {
      %394 = vector.broadcast %26 : vector<8x1xf32> to vector<8x32xf32>
      %395 = arith.mulf %201, %394 : vector<8x32xf32>
      %396 = arith.truncf %395 : vector<8x32xf32> to vector<8x32xbf16>
      %c0_167 = arith.constant 0 : index
      %c0_168 = arith.constant 0 : index
      %397 = vector.load %arg19[%c0_167, %c0_168] : memref<32x32xbf16, #tpu.memory_space<vmem>>, vector<32x32xbf16>
      %cst_169 = arith.constant dense<0.000000e+00> : vector<8x32xf32>
      %398 = tpu.matmul %396, %397, %cst_169 {dimension_numbers = #tpu.dot_dimension_numbers<[1], [0], [0], [1], [0, 0, 1, 1], [], []>} : vector<8x32xbf16>, vector<32x32xbf16>, vector<8x32xf32> -> vector<8x32xf32>
      %c0_170 = arith.constant 0 : index
      %c0_171 = arith.constant 0 : index
      %399 = vector.load %arg20[%c0_170, %c0_171] : memref<1x32xf32, #tpu.memory_space<vmem>>, vector<1x32xf32>
      %400 = vector.broadcast %399 : vector<1x32xf32> to vector<8x32xf32>
      %401 = arith.addf %398, %400 : vector<8x32xf32>
      %402 = vector.broadcast %26 : vector<8x1xf32> to vector<8x32xf32>
      %403 = arith.mulf %401, %402 : vector<8x32xf32>
      %404 = vector.extract_strided_slice %403 {offsets = [0, 0], sizes = [8, 16], strides = [1, 1]} : vector<8x32xf32> to vector<8x16xf32>
      %405 = vector.extract_strided_slice %403 {offsets = [0, 16], sizes = [8, 16], strides = [1, 1]} : vector<8x32xf32> to vector<8x16xf32>
      %406 = math.exp %405 : vector<8x16xf32>
      %c0_172 = arith.constant 0 : index
      %c0_173 = arith.constant 0 : index
      %c0_174 = arith.constant 0 : index
      %407 = vector.load %arg4[%c0_172, %c0_173, %c0_174] : memref<2x8x16xf32, #tpu.memory_space<vmem>>, vector<1x8x16xf32>
      %408 = vector.shape_cast %407 : vector<1x8x16xf32> to vector<8x16xf32>
      %409 = arith.mulf %406, %408 : vector<8x16xf32>
      %cst_175 = arith.constant 6.666600e-01 : f32
      %410 = vector.broadcast %cst_175 : f32 to vector<8x16xf32>
      %411 = arith.mulf %409, %410 : vector<8x16xf32>
      %412 = arith.addf %404, %411 : vector<8x16xf32>
      %413 = vector.broadcast %26 : vector<8x1xf32> to vector<8x16xf32>
      %414 = arith.mulf %412, %413 : vector<8x16xf32>
      %415 = tpu.concatenate %404, %405, %414 in 1 : vector<8x16xf32>, vector<8x16xf32>, vector<8x16xf32> -> vector<8x48xf32>
      %c0_176 = arith.constant 0 : index
      %c0_177 = arith.constant 0 : index
      %c0_178 = arith.constant 0 : index
      %416 = vector.load %arg21[%c0_176, %c0_177, %c0_178] : memref<2x8x48xf32, #tpu.memory_space<vmem>>, vector<1x8x48xf32>
      %417 = vector.shape_cast %416 : vector<1x8x48xf32> to vector<8x48xf32>
      %418 = vector.shape_cast %415 : vector<8x48xf32> to vector<1x8x48xf32>
      tpu.vector_store %arg21[%c0_176, %c0_177, %c0_178], %418 {strides = array<i32>} : memref<2x8x48xf32, #tpu.memory_space<vmem>>, vector<1x8x48xf32>,
    } else {
    }
    %c1_95 = arith.constant 1 : index
    %208 = memref.load %arg1[%c1_95] : memref<2xi32, #tpu.memory_space<smem>>
    %209 = vector.broadcast %208 : i32 to vector<8x1xi32>
    %210 = arith.cmpi slt, %0, %209 : vector<8x1xi32>
    %211 = arith.extui %210 : vector<8x1xi1> to vector<8x1xi32>
    %212 = arith.sitofp %211 : vector<8x1xi32> to vector<8x1xf32>
    %213 = vector.broadcast %208 : i32 to vector<1x8xi32>
    %214 = arith.cmpi slt, %1, %213 : vector<1x8xi32>
    %c0_i32_96 = arith.constant 0 : i32
    %215 = arith.cmpi eq, %arg0, %c0_i32_96 : i32
    %216 = arith.extui %215 : i1 to i32
    %c0_i32_97 = arith.constant 0 : i32
    %217 = arith.cmpi ne, %216, %c0_i32_97 : i32
    scf.if %217 {
      %c1_167 = arith.constant 1 : index
      %c0_168 = arith.constant 0 : index
      %c0_169 = arith.constant 0 : index
      %394 = vector.load %arg2[%c1_167, %c0_168, %c0_169] : memref<2x8x32xf32, #tpu.memory_space<vmem>>, vector<1x8x32xf32>
      %395 = vector.shape_cast %394 : vector<1x8x32xf32> to vector<8x32xf32>
      %396 = arith.truncf %395 : vector<8x32xf32> to vector<8x32xbf16>
      %c0_170 = arith.constant 0 : index
      %c0_171 = arith.constant 0 : index
      %397 = vector.load %arg5[%c0_170, %c0_171] : memref<32x32xbf16, #tpu.memory_space<vmem>>, vector<32x32xbf16>
      %cst_172 = arith.constant dense<0.000000e+00> : vector<8x32xf32>
      %398 = tpu.matmul %396, %397, %cst_172 {dimension_numbers = #tpu.dot_dimension_numbers<[1], [0], [0], [1], [0, 0, 1, 1], [], []>} : vector<8x32xbf16>, vector<32x32xbf16>, vector<8x32xf32> -> vector<8x32xf32>
      %c0_173 = arith.constant 0 : index
      %c0_174 = arith.constant 0 : index
      %399 = vector.load %arg6[%c0_173, %c0_174] : memref<1x32xf32, #tpu.memory_space<vmem>>, vector<1x32xf32>
      %400 = vector.broadcast %399 : vector<1x32xf32> to vector<8x32xf32>
      %401 = arith.addf %398, %400 : vector<8x32xf32>
      %c1_175 = arith.constant 1 : index
      %c0_176 = arith.constant 0 : index
      %c0_177 = arith.constant 0 : index
      %402 = vector.load %arg3[%c1_175, %c0_176, %c0_177] : memref<2x8x32xf32, #tpu.memory_space<vmem>>, vector<1x8x32xf32>
      %403 = vector.shape_cast %402 : vector<1x8x32xf32> to vector<8x32xf32>
      %404 = arith.addf %401, %403 : vector<8x32xf32>
      %cst_178 = arith.constant 5.65685415 : f32
      %405 = vector.broadcast %cst_178 : f32 to vector<8x32xf32>
      %406 = arith.mulf %404, %405 : vector<8x32xf32>
      %cst_179 = arith.constant 0.000000e+00 : f32
      %407 = vector.broadcast %cst_179 : f32 to vector<8x32xf32>
      %408 = arith.cmpf ogt, %406, %407 : vector<8x32xf32>
      %cst_180 = arith.constant 1.000000e-01 : f32
      %409 = vector.broadcast %cst_180 : f32 to vector<8x32xf32>
      %410 = arith.mulf %409, %406 : vector<8x32xf32>
      %411 = arith.select %408, %406, %410 : vector<8x32xi1>, vector<8x32xf32>
      %412 = vector.broadcast %212 : vector<8x1xf32> to vector<8x32xf32>
      %413 = arith.mulf %411, %412 : vector<8x32xf32>
      %c1_181 = arith.constant 1 : index
      %c0_182 = arith.constant 0 : index
      %c0_183 = arith.constant 0 : index
      %414 = vector.load %arg22[%c1_181, %c0_182, %c0_183] : memref<2x8x32xf32, #tpu.memory_space<vmem>>, vector<1x8x32xf32>
      %415 = vector.shape_cast %414 : vector<1x8x32xf32> to vector<8x32xf32>
      %416 = vector.shape_cast %413 : vector<8x32xf32> to vector<1x8x32xf32>
      tpu.vector_store %arg22[%c1_181, %c0_182, %c0_183], %416 {strides = array<i32>} : memref<2x8x32xf32, #tpu.memory_space<vmem>>, vector<1x8x32xf32>,
    } else {
    }
    %c1_98 = arith.constant 1 : index
    %c0_99 = arith.constant 0 : index
    %c0_100 = arith.constant 0 : index
    %218 = vector.load %arg22[%c1_98, %c0_99, %c0_100] : memref<2x8x32xf32, #tpu.memory_space<vmem>>, vector<1x8x32xf32>
    %219 = vector.shape_cast %218 : vector<1x8x32xf32> to vector<8x32xf32>
    %220 = arith.truncf %219 : vector<8x32xf32> to vector<8x32xbf16>
    %cst_101 = arith.constant dense<0.000000e+00> : vector<8x96xf32>
    %221 = tpu.matmul %220, %3, %cst_101 {dimension_numbers = #tpu.dot_dimension_numbers<[1], [0], [0], [1], [0, 0, 1, 1], [], []>} : vector<8x32xbf16>, vector<32x96xbf16>, vector<8x96xf32> -> vector<8x96xf32>
    %222 = vector.broadcast %5 : vector<1x96xf32> to vector<8x96xf32>
    %223 = arith.addf %221, %222 : vector<8x96xf32>
    %224 = vector.extract_strided_slice %223 {offsets = [0, 0], sizes = [8, 32], strides = [1, 1]} : vector<8x96xf32> to vector<8x32xf32>
    %cst_102 = arith.constant 2.500000e-01 : f32
    %225 = vector.broadcast %cst_102 : f32 to vector<8x32xf32>
    %226 = arith.mulf %224, %225 : vector<8x32xf32>
    %227 = vector.extract_strided_slice %223 {offsets = [0, 32], sizes = [8, 32], strides = [1, 1]} : vector<8x96xf32> to vector<8x32xf32>
    %228 = vector.extract_strided_slice %223 {offsets = [0, 64], sizes = [8, 32], strides = [1, 1]} : vector<8x96xf32> to vector<8x32xf32>
    %229 = vector.extract_strided_slice %226 {offsets = [0, 0], sizes = [8, 16], strides = [1, 1]} : vector<8x32xf32> to vector<8x16xf32>
    %230 = vector.shape_cast %229 : vector<8x16xf32> to vector<1x8x16xf32>
    %231 = vector.extract_strided_slice %226 {offsets = [0, 16], sizes = [8, 16], strides = [1, 1]} : vector<8x32xf32> to vector<8x16xf32>
    %232 = vector.shape_cast %231 : vector<8x16xf32> to vector<1x8x16xf32>
    %233 = tpu.concatenate %230, %232 in 0 : vector<1x8x16xf32>, vector<1x8x16xf32> -> vector<2x8x16xf32>
    %234 = arith.truncf %233 : vector<2x8x16xf32> to vector<2x8x16xbf16>
    %235 = vector.extract_strided_slice %227 {offsets = [0, 0], sizes = [8, 16], strides = [1, 1]} : vector<8x32xf32> to vector<8x16xf32>
    %236 = vector.shape_cast %235 : vector<8x16xf32> to vector<1x8x16xf32>
    %237 = vector.extract_strided_slice %227 {offsets = [0, 16], sizes = [8, 16], strides = [1, 1]} : vector<8x32xf32> to vector<8x16xf32>
    %238 = vector.shape_cast %237 : vector<8x16xf32> to vector<1x8x16xf32>
    %239 = tpu.concatenate %236, %238 in 0 : vector<1x8x16xf32>, vector<1x8x16xf32> -> vector<2x8x16xf32>
    %240 = arith.truncf %239 : vector<2x8x16xf32> to vector<2x8x16xbf16>
    %241 = vector.extract_strided_slice %228 {offsets = [0, 0], sizes = [8, 16], strides = [1, 1]} : vector<8x32xf32> to vector<8x16xf32>
    %242 = vector.shape_cast %241 : vector<8x16xf32> to vector<1x8x16xf32>
    %243 = vector.extract_strided_slice %228 {offsets = [0, 16], sizes = [8, 16], strides = [1, 1]} : vector<8x32xf32> to vector<8x16xf32>
    %244 = vector.shape_cast %243 : vector<8x16xf32> to vector<1x8x16xf32>
    %245 = tpu.concatenate %242, %244 in 0 : vector<1x8x16xf32>, vector<1x8x16xf32> -> vector<2x8x16xf32>
    %246 = arith.truncf %245 : vector<2x8x16xf32> to vector<2x8x16xbf16>
    "tpu.trace_start"() <{level = 10 : i32, message = "hqd,hkd->hqk"}> : () -> ()
    %cst_103 = arith.constant dense<0.000000e+00> : vector<2x8x8xf32>
    %247 = tpu.matmul %234, %240, %cst_103 {dimension_numbers = #tpu.dot_dimension_numbers<[2], [2], [1], [1], [0, 0, 0, 1, 1, 1], [0], [0]>} : vector<2x8x16xbf16>, vector<2x8x16xbf16>, vector<2x8x8xf32> -> vector<2x8x8xf32>
    "tpu.trace_stop"() : () -> ()
    %248 = vector.shape_cast %214 : vector<1x8xi1> to vector<1x1x8xi1>
    %cst_104 = arith.constant -1.000000e+04 : f32
    %249 = vector.shape_cast %248 : vector<1x1x8xi1> to vector<1x1x8xi1>
    %250 = vector.broadcast %249 : vector<1x1x8xi1> to vector<2x8x8xi1>
    %251 = vector.broadcast %cst_104 : f32 to vector<2x8x8xf32>
    %252 = arith.select %250, %247, %251 : vector<2x8x8xi1>, vector<2x8x8xf32>
    %cst_105 = arith.constant dense<0xFF800000> : vector<2x8xf32>
    %253 = vector.multi_reduction <maximumf>, %252, %cst_105 [2] : vector<2x8x8xf32> to vector<2x8xf32>
    %254 = vector.shape_cast %253 : vector<2x8xf32> to vector<2x8x1xf32>
    %255 = vector.broadcast %254 : vector<2x8x1xf32> to vector<2x8x8xf32>
    %256 = arith.subf %252, %255 : vector<2x8x8xf32>
    %257 = math.exp %256 : vector<2x8x8xf32>
    %cst_106 = arith.constant dense<0.000000e+00> : vector<2x8xf32>
    %258 = vector.multi_reduction <add>, %257, %cst_106 [2] : vector<2x8x8xf32> to vector<2x8xf32>
    %259 = vector.shape_cast %258 : vector<2x8xf32> to vector<2x8x1xf32>
    %260 = tpu.reciprocal %259 {approx = true} : vector<2x8x1xf32> -> vector<2x8x1xf32>
    %261 = vector.broadcast %260 : vector<2x8x1xf32> to vector<2x8x8xf32>
    %262 = arith.mulf %257, %261 : vector<2x8x8xf32>
    %263 = arith.truncf %262 : vector<2x8x8xf32> to vector<2x8x8xbf16>
    "tpu.trace_start"() <{level = 10 : i32, message = "hqk,hkd->hqd"}> : () -> ()
    %cst_107 = arith.constant dense<0.000000e+00> : vector<2x8x16xf32>
    %264 = tpu.matmul %263, %246, %cst_107 {dimension_numbers = #tpu.dot_dimension_numbers<[2], [1], [1], [2], [0, 0, 0, 1, 1, 2], [0], [0]>} : vector<2x8x8xbf16>, vector<2x8x16xbf16>, vector<2x8x16xf32> -> vector<2x8x16xf32>
    "tpu.trace_stop"() : () -> ()
    %265 = vector.extract_strided_slice %264 {offsets = [0, 0, 0], sizes = [1, 8, 16], strides = [1, 1, 1]} : vector<2x8x16xf32> to vector<1x8x16xf32>
    %266 = vector.shape_cast %265 : vector<1x8x16xf32> to vector<8x16xf32>
    %267 = vector.extract_strided_slice %264 {offsets = [1, 0, 0], sizes = [1, 8, 16], strides = [1, 1, 1]} : vector<2x8x16xf32> to vector<1x8x16xf32>
    %268 = vector.shape_cast %267 : vector<1x8x16xf32> to vector<8x16xf32>
    %269 = tpu.concatenate %266, %268 in 1 : vector<8x16xf32>, vector<8x16xf32> -> vector<8x32xf32>
    %270 = arith.truncf %269 : vector<8x32xf32> to vector<8x32xbf16>
    %cst_108 = arith.constant dense<0.000000e+00> : vector<8x32xf32>
    %271 = tpu.matmul %270, %7, %cst_108 {dimension_numbers = #tpu.dot_dimension_numbers<[1], [0], [0], [1], [0, 0, 1, 1], [], []>} : vector<8x32xbf16>, vector<32x32xbf16>, vector<8x32xf32> -> vector<8x32xf32>
    %272 = vector.broadcast %9 : vector<1x32xf32> to vector<8x32xf32>
    %273 = arith.addf %271, %272 : vector<8x32xf32>
    %274 = arith.addf %219, %273 : vector<8x32xf32>
    %cst_109 = arith.constant dense<0.000000e+00> : vector<8xf32>
    %275 = vector.multi_reduction <add>, %274, %cst_109 [1] : vector<8x32xf32> to vector<8xf32>
    %276 = vector.shape_cast %275 : vector<8xf32> to vector<8x1xf32>
    %cst_110 = arith.constant 3.200000e+01 : f32
    %277 = vector.broadcast %cst_110 : f32 to vector<8x1xf32>
    %278 = arith.divf %276, %277 : vector<8x1xf32>
    %279 = vector.broadcast %278 : vector<8x1xf32> to vector<8x32xf32>
    %280 = arith.subf %274, %279 : vector<8x32xf32>
    %281 = arith.mulf %280, %280 : vector<8x32xf32>
    %cst_111 = arith.constant dense<0.000000e+00> : vector<8xf32>
    %282 = vector.multi_reduction <add>, %281, %cst_111 [1] : vector<8x32xf32> to vector<8xf32>
    %283 = vector.shape_cast %282 : vector<8xf32> to vector<8x1xf32>
    %cst_112 = arith.constant 3.200000e+01 : f32
    %284 = vector.broadcast %cst_112 : f32 to vector<8x1xf32>
    %285 = arith.divf %283, %284 : vector<8x1xf32>
    %286 = vector.broadcast %278 : vector<8x1xf32> to vector<8x32xf32>
    %287 = arith.subf %274, %286 : vector<8x32xf32>
    %cst_113 = arith.constant 9.99999974E-6 : f32
    %288 = vector.broadcast %cst_113 : f32 to vector<8x1xf32>
    %289 = arith.addf %285, %288 : vector<8x1xf32>
    %290 = math.rsqrt %289 : vector<8x1xf32>
    %291 = vector.broadcast %290 : vector<8x1xf32> to vector<8x32xf32>
    %292 = arith.mulf %287, %291 : vector<8x32xf32>
    %293 = vector.broadcast %11 : vector<1x32xf32> to vector<8x32xf32>
    %294 = arith.mulf %292, %293 : vector<8x32xf32>
    %295 = vector.broadcast %13 : vector<1x32xf32> to vector<8x32xf32>
    %296 = arith.addf %294, %295 : vector<8x32xf32>
    %297 = vector.broadcast %212 : vector<8x1xf32> to vector<8x32xf32>
    %298 = arith.mulf %296, %297 : vector<8x32xf32>
    %c1_i32_114 = arith.constant 1 : i32
    %299 = tpu.dynamic_rotate %298 by %c1_i32_114 dim 0 : vector<8x32xf32>, i32 -> vector<8x32xf32>
    %c1_i32_115 = arith.constant 1 : i32
    %300 = vector.broadcast %c1_i32_115 : i32 to vector<8x1xi32>
    %301 = arith.cmpi sge, %0, %300 : vector<8x1xi32>
    %cst_116 = arith.constant 0.000000e+00 : f32
    %302 = vector.shape_cast %301 : vector<8x1xi1> to vector<8x1xi1>
    %303 = vector.broadcast %302 : vector<8x1xi1> to vector<8x32xi1>
    %304 = vector.broadcast %cst_116 : f32 to vector<8x32xf32>
    %305 = arith.select %303, %299, %304 : vector<8x32xi1>, vector<8x32xf32>
    %306 = arith.truncf %305 : vector<8x32xf32> to vector<8x32xbf16>
    %c0_117 = arith.constant 0 : index
    %c0_118 = arith.constant 0 : index
    %c0_119 = arith.constant 0 : index
    %c0_120 = arith.constant 0 : index
    %307 = vector.load %arg13[%c0_117, %c0_118, %c0_119, %c0_120] : memref<1x3x32x64xbf16, #tpu.memory_space<vmem>>, vector<1x1x32x64xbf16>
    %308 = vector.shape_cast %307 : vector<1x1x32x64xbf16> to vector<32x64xbf16>
    %cst_121 = arith.constant dense<0.000000e+00> : vector<8x64xf32>
    %309 = tpu.matmul %306, %308, %cst_121 {dimension_numbers = #tpu.dot_dimension_numbers<[1], [0], [0], [1], [0, 0, 1, 1], [], []>} : vector<8x32xbf16>, vector<32x64xbf16>, vector<8x64xf32> -> vector<8x64xf32>
    %310 = arith.truncf %298 : vector<8x32xf32> to vector<8x32xbf16>
    %c0_122 = arith.constant 0 : index
    %c1_123 = arith.constant 1 : index
    %c0_124 = arith.constant 0 : index
    %c0_125 = arith.constant 0 : index
    %311 = vector.load %arg13[%c0_122, %c1_123, %c0_124, %c0_125] : memref<1x3x32x64xbf16, #tpu.memory_space<vmem>>, vector<1x1x32x64xbf16>
    %312 = vector.shape_cast %311 : vector<1x1x32x64xbf16> to vector<32x64xbf16>
    %cst_126 = arith.constant dense<0.000000e+00> : vector<8x64xf32>
    %313 = tpu.matmul %310, %312, %cst_126 {dimension_numbers = #tpu.dot_dimension_numbers<[1], [0], [0], [1], [0, 0, 1, 1], [], []>} : vector<8x32xbf16>, vector<32x64xbf16>, vector<8x64xf32> -> vector<8x64xf32>
    %314 = arith.addf %309, %313 : vector<8x64xf32>
    %c7_i32_127 = arith.constant 7 : i32
    %315 = tpu.dynamic_rotate %298 by %c7_i32_127 dim 0 : vector<8x32xf32>, i32 -> vector<8x32xf32>
    %c7_i32_128 = arith.constant 7 : i32
    %316 = vector.broadcast %c7_i32_128 : i32 to vector<8x1xi32>
    %317 = arith.cmpi slt, %0, %316 : vector<8x1xi32>
    %cst_129 = arith.constant 0.000000e+00 : f32
    %318 = vector.shape_cast %317 : vector<8x1xi1> to vector<8x1xi1>
    %319 = vector.broadcast %318 : vector<8x1xi1> to vector<8x32xi1>
    %320 = vector.broadcast %cst_129 : f32 to vector<8x32xf32>
    %321 = arith.select %319, %315, %320 : vector<8x32xi1>, vector<8x32xf32>
    %322 = arith.truncf %321 : vector<8x32xf32> to vector<8x32xbf16>
    %c0_130 = arith.constant 0 : index
    %c2_131 = arith.constant 2 : index
    %c0_132 = arith.constant 0 : index
    %c0_133 = arith.constant 0 : index
    %323 = vector.load %arg13[%c0_130, %c2_131, %c0_132, %c0_133] : memref<1x3x32x64xbf16, #tpu.memory_space<vmem>>, vector<1x1x32x64xbf16>
    %324 = vector.shape_cast %323 : vector<1x1x32x64xbf16> to vector<32x64xbf16>
    %cst_134 = arith.constant dense<0.000000e+00> : vector<8x64xf32>
    %325 = tpu.matmul %322, %324, %cst_134 {dimension_numbers = #tpu.dot_dimension_numbers<[1], [0], [0], [1], [0, 0, 1, 1], [], []>} : vector<8x32xbf16>, vector<32x64xbf16>, vector<8x64xf32> -> vector<8x64xf32>
    %326 = arith.addf %314, %325 : vector<8x64xf32>
    %327 = vector.broadcast %19 : vector<1x64xf32> to vector<8x64xf32>
    %328 = arith.addf %326, %327 : vector<8x64xf32>
    %cst_135 = arith.constant 0.000000e+00 : f32
    %329 = vector.broadcast %cst_135 : f32 to vector<8x64xf32>
    %330 = arith.maximumf %328, %329 : vector<8x64xf32>
    %331 = vector.broadcast %212 : vector<8x1xf32> to vector<8x64xf32>
    %332 = arith.mulf %330, %331 : vector<8x64xf32>
    %c1_i32_136 = arith.constant 1 : i32
    %333 = tpu.dynamic_rotate %332 by %c1_i32_136 dim 0 : vector<8x64xf32>, i32 -> vector<8x64xf32>
    %c1_i32_137 = arith.constant 1 : i32
    %334 = vector.broadcast %c1_i32_137 : i32 to vector<8x1xi32>
    %335 = arith.cmpi sge, %0, %334 : vector<8x1xi32>
    %cst_138 = arith.constant 0.000000e+00 : f32
    %336 = vector.shape_cast %335 : vector<8x1xi1> to vector<8x1xi1>
    %337 = vector.broadcast %336 : vector<8x1xi1> to vector<8x64xi1>
    %338 = vector.broadcast %cst_138 : f32 to vector<8x64xf32>
    %339 = arith.select %337, %333, %338 : vector<8x64xi1>, vector<8x64xf32>
    %340 = arith.truncf %339 : vector<8x64xf32> to vector<8x64xbf16>
    %c0_139 = arith.constant 0 : index
    %c0_140 = arith.constant 0 : index
    %c0_141 = arith.constant 0 : index
    %c0_142 = arith.constant 0 : index
    %341 = vector.load %arg15[%c0_139, %c0_140, %c0_141, %c0_142] : memref<1x3x64x32xbf16, #tpu.memory_space<vmem>>, vector<1x1x64x32xbf16>
    %342 = vector.shape_cast %341 : vector<1x1x64x32xbf16> to vector<64x32xbf16>
    %cst_143 = arith.constant dense<0.000000e+00> : vector<8x32xf32>
    %343 = tpu.matmul %340, %342, %cst_143 {dimension_numbers = #tpu.dot_dimension_numbers<[1], [0], [0], [1], [0, 0, 1, 1], [], []>} : vector<8x64xbf16>, vector<64x32xbf16>, vector<8x32xf32> -> vector<8x32xf32>
    %344 = arith.truncf %332 : vector<8x64xf32> to vector<8x64xbf16>
    %c0_144 = arith.constant 0 : index
    %c1_145 = arith.constant 1 : index
    %c0_146 = arith.constant 0 : index
    %c0_147 = arith.constant 0 : index
    %345 = vector.load %arg15[%c0_144, %c1_145, %c0_146, %c0_147] : memref<1x3x64x32xbf16, #tpu.memory_space<vmem>>, vector<1x1x64x32xbf16>
    %346 = vector.shape_cast %345 : vector<1x1x64x32xbf16> to vector<64x32xbf16>
    %cst_148 = arith.constant dense<0.000000e+00> : vector<8x32xf32>
    %347 = tpu.matmul %344, %346, %cst_148 {dimension_numbers = #tpu.dot_dimension_numbers<[1], [0], [0], [1], [0, 0, 1, 1], [], []>} : vector<8x64xbf16>, vector<64x32xbf16>, vector<8x32xf32> -> vector<8x32xf32>
    %348 = arith.addf %343, %347 : vector<8x32xf32>
    %c7_i32_149 = arith.constant 7 : i32
    %349 = tpu.dynamic_rotate %332 by %c7_i32_149 dim 0 : vector<8x64xf32>, i32 -> vector<8x64xf32>
    %c7_i32_150 = arith.constant 7 : i32
    %350 = vector.broadcast %c7_i32_150 : i32 to vector<8x1xi32>
    %351 = arith.cmpi slt, %0, %350 : vector<8x1xi32>
    %cst_151 = arith.constant 0.000000e+00 : f32
    %352 = vector.shape_cast %351 : vector<8x1xi1> to vector<8x1xi1>
    %353 = vector.broadcast %352 : vector<8x1xi1> to vector<8x64xi1>
    %354 = vector.broadcast %cst_151 : f32 to vector<8x64xf32>
    %355 = arith.select %353, %349, %354 : vector<8x64xi1>, vector<8x64xf32>
    %356 = arith.truncf %355 : vector<8x64xf32> to vector<8x64xbf16>
    %c0_152 = arith.constant 0 : index
    %c2_153 = arith.constant 2 : index
    %c0_154 = arith.constant 0 : index
    %c0_155 = arith.constant 0 : index
    %357 = vector.load %arg15[%c0_152, %c2_153, %c0_154, %c0_155] : memref<1x3x64x32xbf16, #tpu.memory_space<vmem>>, vector<1x1x64x32xbf16>
    %358 = vector.shape_cast %357 : vector<1x1x64x32xbf16> to vector<64x32xbf16>
    %cst_156 = arith.constant dense<0.000000e+00> : vector<8x32xf32>
    %359 = tpu.matmul %356, %358, %cst_156 {dimension_numbers = #tpu.dot_dimension_numbers<[1], [0], [0], [1], [0, 0, 1, 1], [], []>} : vector<8x64xbf16>, vector<64x32xbf16>, vector<8x32xf32> -> vector<8x32xf32>
    %360 = arith.addf %348, %359 : vector<8x32xf32>
    %361 = vector.broadcast %21 : vector<1x32xf32> to vector<8x32xf32>
    %362 = arith.addf %360, %361 : vector<8x32xf32>
    %363 = vector.broadcast %212 : vector<8x1xf32> to vector<8x32xf32>
    %364 = arith.mulf %362, %363 : vector<8x32xf32>
    %365 = arith.addf %296, %364 : vector<8x32xf32>
    %cst_157 = arith.constant dense<0.000000e+00> : vector<8xf32>
    %366 = vector.multi_reduction <add>, %365, %cst_157 [1] : vector<8x32xf32> to vector<8xf32>
    %367 = vector.shape_cast %366 : vector<8xf32> to vector<8x1xf32>
    %cst_158 = arith.constant 3.200000e+01 : f32
    %368 = vector.broadcast %cst_158 : f32 to vector<8x1xf32>
    %369 = arith.divf %367, %368 : vector<8x1xf32>
    %370 = vector.broadcast %369 : vector<8x1xf32> to vector<8x32xf32>
    %371 = arith.subf %365, %370 : vector<8x32xf32>
    %372 = arith.mulf %371, %371 : vector<8x32xf32>
    %cst_159 = arith.constant dense<0.000000e+00> : vector<8xf32>
    %373 = vector.multi_reduction <add>, %372, %cst_159 [1] : vector<8x32xf32> to vector<8xf32>
    %374 = vector.shape_cast %373 : vector<8xf32> to vector<8x1xf32>
    %cst_160 = arith.constant 3.200000e+01 : f32
    %375 = vector.broadcast %cst_160 : f32 to vector<8x1xf32>
    %376 = arith.divf %374, %375 : vector<8x1xf32>
    %377 = vector.broadcast %369 : vector<8x1xf32> to vector<8x32xf32>
    %378 = arith.subf %365, %377 : vector<8x32xf32>
    %cst_161 = arith.constant 9.99999974E-6 : f32
    %379 = vector.broadcast %cst_161 : f32 to vector<8x1xf32>
    %380 = arith.addf %376, %379 : vector<8x1xf32>
    %381 = math.rsqrt %380 : vector<8x1xf32>
    %382 = vector.broadcast %381 : vector<8x1xf32> to vector<8x32xf32>
    %383 = arith.mulf %378, %382 : vector<8x32xf32>
    %384 = vector.broadcast %15 : vector<1x32xf32> to vector<8x32xf32>
    %385 = arith.mulf %383, %384 : vector<8x32xf32>
    %386 = vector.broadcast %17 : vector<1x32xf32> to vector<8x32xf32>
    %387 = arith.addf %385, %386 : vector<8x32xf32>
    %c1_162 = arith.constant 1 : index
    %c0_163 = arith.constant 0 : index
    %c0_164 = arith.constant 0 : index
    %388 = vector.load %arg22[%c1_162, %c0_163, %c0_164] : memref<2x8x32xf32, #tpu.memory_space<vmem>>, vector<1x8x32xf32>
    %389 = vector.shape_cast %388 : vector<1x8x32xf32> to vector<8x32xf32>
    %390 = vector.shape_cast %387 : vector<8x32xf32> to vector<1x8x32xf32>
    tpu.vector_store %arg22[%c1_162, %c0_163, %c0_164], %390 {strides = array<i32>} : memref<2x8x32xf32, #tpu.memory_space<vmem>>, vector<1x8x32xf32>,
    %c1_i32_165 = arith.constant 1 : i32
    %391 = arith.cmpi eq, %arg0, %c1_i32_165 : i32
    %392 = arith.extui %391 : i1 to i32
    %c0_i32_166 = arith.constant 0 : i32
    %393 = arith.cmpi ne, %392, %c0_i32_166 : i32
    scf.if %393 {
      %394 = vector.broadcast %212 : vector<8x1xf32> to vector<8x32xf32>
      %395 = arith.mulf %387, %394 : vector<8x32xf32>
      %396 = arith.truncf %395 : vector<8x32xf32> to vector<8x32xbf16>
      %c0_167 = arith.constant 0 : index
      %c0_168 = arith.constant 0 : index
      %397 = vector.load %arg19[%c0_167, %c0_168] : memref<32x32xbf16, #tpu.memory_space<vmem>>, vector<32x32xbf16>
      %cst_169 = arith.constant dense<0.000000e+00> : vector<8x32xf32>
      %398 = tpu.matmul %396, %397, %cst_169 {dimension_numbers = #tpu.dot_dimension_numbers<[1], [0], [0], [1], [0, 0, 1, 1], [], []>} : vector<8x32xbf16>, vector<32x32xbf16>, vector<8x32xf32> -> vector<8x32xf32>
      %c0_170 = arith.constant 0 : index
      %c0_171 = arith.constant 0 : index
      %399 = vector.load %arg20[%c0_170, %c0_171] : memref<1x32xf32, #tpu.memory_space<vmem>>, vector<1x32xf32>
      %400 = vector.broadcast %399 : vector<1x32xf32> to vector<8x32xf32>
      %401 = arith.addf %398, %400 : vector<8x32xf32>
      %402 = vector.broadcast %212 : vector<8x1xf32> to vector<8x32xf32>
      %403 = arith.mulf %401, %402 : vector<8x32xf32>
      %404 = vector.extract_strided_slice %403 {offsets = [0, 0], sizes = [8, 16], strides = [1, 1]} : vector<8x32xf32> to vector<8x16xf32>
      %405 = vector.extract_strided_slice %403 {offsets = [0, 16], sizes = [8, 16], strides = [1, 1]} : vector<8x32xf32> to vector<8x16xf32>
      %406 = math.exp %405 : vector<8x16xf32>
      %c1_172 = arith.constant 1 : index
      %c0_173 = arith.constant 0 : index
      %c0_174 = arith.constant 0 : index
      %407 = vector.load %arg4[%c1_172, %c0_173, %c0_174] : memref<2x8x16xf32, #tpu.memory_space<vmem>>, vector<1x8x16xf32>
      %408 = vector.shape_cast %407 : vector<1x8x16xf32> to vector<8x16xf32>
      %409 = arith.mulf %406, %408 : vector<8x16xf32>
      %cst_175 = arith.constant 6.666600e-01 : f32
      %410 = vector.broadcast %cst_175 : f32 to vector<8x16xf32>
      %411 = arith.mulf %409, %410 : vector<8x16xf32>
      %412 = arith.addf %404, %411 : vector<8x16xf32>
      %413 = vector.broadcast %212 : vector<8x1xf32> to vector<8x16xf32>
      %414 = arith.mulf %412, %413 : vector<8x16xf32>
      %415 = tpu.concatenate %404, %405, %414 in 1 : vector<8x16xf32>, vector<8x16xf32>, vector<8x16xf32> -> vector<8x48xf32>
      %c1_176 = arith.constant 1 : index
      %c0_177 = arith.constant 0 : index
      %c0_178 = arith.constant 0 : index
      %416 = vector.load %arg21[%c1_176, %c0_177, %c0_178] : memref<2x8x48xf32, #tpu.memory_space<vmem>>, vector<1x8x48xf32>
      %417 = vector.shape_cast %416 : vector<1x8x48xf32> to vector<8x48xf32>
      %418 = vector.shape_cast %415 : vector<8x48xf32> to vector<1x8x48xf32>
      tpu.vector_store %arg21[%c1_176, %c0_177, %c0_178], %418 {strides = array<i32>} : memref<2x8x48xf32, #tpu.memory_space<vmem>>, vector<1x8x48xf32>,
    } else {
    }
    return
  }
  func.func @transform_0(%arg0: i32, %arg1: memref<2xi32, #tpu.memory_space<smem>>) -> (i32, i32, i32) {
    %c0_i32 = arith.constant 0 : i32
    %c0_i32_0 = arith.constant 0 : i32
    %c0_i32_1 = arith.constant 0 : i32
    %c0_i32_2 = arith.constant 0 : i32
    return %c0_i32, %c0_i32_0, %c0_i32_1 : i32, i32, i32
  }
  func.func @transform_1(%arg0: i32, %arg1: memref<2xi32, #tpu.memory_space<smem>>) -> (i32, i32, i32) {
    %c0_i32 = arith.constant 0 : i32
    %c0_i32_0 = arith.constant 0 : i32
    %c0_i32_1 = arith.constant 0 : i32
    %c0_i32_2 = arith.constant 0 : i32
    return %c0_i32, %c0_i32_0, %c0_i32_1 : i32, i32, i32
  }
  func.func @transform_2(%arg0: i32, %arg1: memref<2xi32, #tpu.memory_space<smem>>) -> (i32, i32, i32) {
    %c0_i32 = arith.constant 0 : i32
    %c0_i32_0 = arith.constant 0 : i32
    %c0_i32_1 = arith.constant 0 : i32
    %c0_i32_2 = arith.constant 0 : i32
    return %c0_i32, %c0_i32_0, %c0_i32_1 : i32, i32, i32
  }
  func.func @transform_3(%arg0: i32, %arg1: memref<2xi32, #tpu.memory_space<smem>>) -> (i32, i32) {
    %c0_i32 = arith.constant 0 : i32
    %c0_i32_0 = arith.constant 0 : i32
    %c0_i32_1 = arith.constant 0 : i32
    return %c0_i32, %c0_i32_0 : i32, i32
  }
  func.func @transform_4(%arg0: i32, %arg1: memref<2xi32, #tpu.memory_space<smem>>) -> (i32, i32) {
    %c0_i32 = arith.constant 0 : i32
    %c0_i32_0 = arith.constant 0 : i32
    %c0_i32_1 = arith.constant 0 : i32
    return %c0_i32, %c0_i32_0 : i32, i32
  }
  func.func @transform_5(%arg0: i32, %arg1: memref<2xi32, #tpu.memory_space<smem>>) -> (i32, i32, i32) {
    %c0_i32 = arith.constant 0 : i32
    %c0_i32_0 = arith.constant 0 : i32
    %c0_i32_1 = arith.constant 0 : i32
    return %arg0, %c0_i32, %c0_i32_0 : i32, i32, i32
  }
  func.func @transform_6(%arg0: i32, %arg1: memref<2xi32, #tpu.memory_space<smem>>) -> (i32, i32, i32) {
    %c0_i32 = arith.constant 0 : i32
    %c0_i32_0 = arith.constant 0 : i32
    %c0_i32_1 = arith.constant 0 : i32
    return %arg0, %c0_i32, %c0_i32_0 : i32, i32, i32
  }
  func.func @transform_7(%arg0: i32, %arg1: memref<2xi32, #tpu.memory_space<smem>>) -> (i32, i32, i32) {
    %c0_i32 = arith.constant 0 : i32
    %c0_i32_0 = arith.constant 0 : i32
    %c0_i32_1 = arith.constant 0 : i32
    return %arg0, %c0_i32, %c0_i32_0 : i32, i32, i32
  }
  func.func @transform_8(%arg0: i32, %arg1: memref<2xi32, #tpu.memory_space<smem>>) -> (i32, i32, i32) {
    %c0_i32 = arith.constant 0 : i32
    %c0_i32_0 = arith.constant 0 : i32
    %c0_i32_1 = arith.constant 0 : i32
    return %arg0, %c0_i32, %c0_i32_0 : i32, i32, i32
  }
  func.func @transform_9(%arg0: i32, %arg1: memref<2xi32, #tpu.memory_space<smem>>) -> (i32, i32, i32) {
    %c0_i32 = arith.constant 0 : i32
    %c0_i32_0 = arith.constant 0 : i32
    %c0_i32_1 = arith.constant 0 : i32
    return %arg0, %c0_i32, %c0_i32_0 : i32, i32, i32
  }
  func.func @transform_10(%arg0: i32, %arg1: memref<2xi32, #tpu.memory_space<smem>>) -> (i32, i32, i32) {
    %c0_i32 = arith.constant 0 : i32
    %c0_i32_0 = arith.constant 0 : i32
    %c0_i32_1 = arith.constant 0 : i32
    return %arg0, %c0_i32, %c0_i32_0 : i32, i32, i32
  }
  func.func @transform_11(%arg0: i32, %arg1: memref<2xi32, #tpu.memory_space<smem>>) -> (i32, i32, i32, i32) {
    %c0_i32 = arith.constant 0 : i32
    %c0_i32_0 = arith.constant 0 : i32
    %c0_i32_1 = arith.constant 0 : i32
    %c0_i32_2 = arith.constant 0 : i32
    return %arg0, %c0_i32, %c0_i32_0, %c0_i32_1 : i32, i32, i32, i32
  }
  func.func @transform_12(%arg0: i32, %arg1: memref<2xi32, #tpu.memory_space<smem>>) -> (i32, i32, i32) {
    %c0_i32 = arith.constant 0 : i32
    %c0_i32_0 = arith.constant 0 : i32
    %c0_i32_1 = arith.constant 0 : i32
    return %arg0, %c0_i32, %c0_i32_0 : i32, i32, i32
  }
  func.func @transform_13(%arg0: i32, %arg1: memref<2xi32, #tpu.memory_space<smem>>) -> (i32, i32, i32, i32) {
    %c0_i32 = arith.constant 0 : i32
    %c0_i32_0 = arith.constant 0 : i32
    %c0_i32_1 = arith.constant 0 : i32
    %c0_i32_2 = arith.constant 0 : i32
    return %arg0, %c0_i32, %c0_i32_0, %c0_i32_1 : i32, i32, i32, i32
  }
  func.func @transform_14(%arg0: i32, %arg1: memref<2xi32, #tpu.memory_space<smem>>) -> (i32, i32, i32) {
    %c0_i32 = arith.constant 0 : i32
    %c0_i32_0 = arith.constant 0 : i32
    %c0_i32_1 = arith.constant 0 : i32
    return %arg0, %c0_i32, %c0_i32_0 : i32, i32, i32
  }
  func.func @transform_15(%arg0: i32, %arg1: memref<2xi32, #tpu.memory_space<smem>>) -> (i32, i32, i32) {
    %c0_i32 = arith.constant 0 : i32
    %c0_i32_0 = arith.constant 0 : i32
    %c0_i32_1 = arith.constant 0 : i32
    return %arg0, %c0_i32, %c0_i32_0 : i32, i32, i32
  }
  func.func @transform_16(%arg0: i32, %arg1: memref<2xi32, #tpu.memory_space<smem>>) -> (i32, i32, i32) {
    %c0_i32 = arith.constant 0 : i32
    %c0_i32_0 = arith.constant 0 : i32
    %c0_i32_1 = arith.constant 0 : i32
    return %arg0, %c0_i32, %c0_i32_0 : i32, i32, i32
  }
  func.func @transform_17(%arg0: i32, %arg1: memref<2xi32, #tpu.memory_space<smem>>) -> (i32, i32) {
    %c0_i32 = arith.constant 0 : i32
    %c0_i32_0 = arith.constant 0 : i32
    %c0_i32_1 = arith.constant 0 : i32
    return %c0_i32, %c0_i32_0 : i32, i32
  }
  func.func @transform_18(%arg0: i32, %arg1: memref<2xi32, #tpu.memory_space<smem>>) -> (i32, i32) {
    %c0_i32 = arith.constant 0 : i32
    %c0_i32_0 = arith.constant 0 : i32
    %c0_i32_1 = arith.constant 0 : i32
    return %c0_i32, %c0_i32_0 : i32, i32
  }
  func.func @transform_19(%arg0: i32, %arg1: memref<2xi32, #tpu.memory_space<smem>>) -> (i32, i32, i32) {
    %c0_i32 = arith.constant 0 : i32
    %c0_i32_0 = arith.constant 0 : i32
    %c0_i32_1 = arith.constant 0 : i32
    %c0_i32_2 = arith.constant 0 : i32
    return %c0_i32, %c0_i32_0, %c0_i32_1 : i32, i32, i32
  }
}

</mosaic_0001>

<bundles_post_ra>
// kernel: tpu_custom_call.1
= control target key start
LH: loop header
LB: loop body
LE: loop exit
PB: predicated region body
PF: predicated region fallthrough
CT: control target
= control target key end

     0   :  { %s4246_s0 = inlined_call_operand.vmem [shape: s32[2], index: 0, kind: input, shape index: {}]   ;;  %s4247_s1 = inlined_call_operand.vmem [shape: f32[2,8,32], index: 1, kind: input, shape index: {}]   ;;  %s4248_s2 = inlined_call_operand.vmem [shape: f32[2,8,32], index: 2, kind: input, shape index: {}]   ;;  %s4249_s3 = inlined_call_operand.vmem [shape: f32[2,8,16], index: 3, kind: input, shape index: {}]   ;;  %s4250_s4 = inlined_call_operand.vmem [shape: bf16[32,32], index: 4, kind: input, shape index: {}]   ;;  %s4251_s5 = inlined_call_operand.vmem [shape: f32[1,32], index: 5, kind: input, shape index: {}]   ;;  %s4252_s6 = inlined_call_operand.vmem [shape: bf16[2,32,96], index: 6, kind: input, shape index: {}]   ;;  %s4253_s7 = inlined_call_operand.vmem [shape: f32[2,1,96], index: 7, kind: input, shape index: {}]   ;;  %s4254_s8 = inlined_call_operand.vmem [shape: bf16[2,32,32], index: 8, kind: input, shape index: {}]   ;;  %s4255_s9 = inlined_call_operand.vmem [shape: f32[2,1,32], index: 9, kind: input, shape index: {}]   ;;  %s4256_s10 = inlined_call_operand.vmem [shape: f32[2,1,32], index: 10, kind: input, shape index: {}]   ;;  %s4257_s11 = inlined_call_operand.vmem [shape: f32[2,1,32], index: 11, kind: input, shape index: {}]   ;;  %s4258_s12 = inlined_call_operand.vmem [shape: bf16[2,3,32,64], index: 12, kind: input, shape index: {}]   ;;  %s4259_s13 = inlined_call_operand.vmem [shape: f32[2,1,64], index: 13, kind: input, shape index: {}]   ;;  %s4260_s14 = inlined_call_operand.vmem [shape: bf16[2,3,64,32], index: 14, kind: input, shape index: {}]   ;;  %s4261_s15 = inlined_call_operand.vmem [shape: f32[2,1,32], index: 15, kind: input, shape index: {}]   ;;  %s4262_s16 = inlined_call_operand.vmem [shape: f32[2,1,32], index: 16, kind: input, shape index: {}]   ;;  %s4263_s17 = inlined_call_operand.vmem [shape: f32[2,1,32], index: 17, kind: input, shape index: {}]   ;;  %s4264_s18 = inlined_call_operand.vmem [shape: bf16[32,32], index: 18, kind: input, shape index: {}]   ;;  %s4265_s19 = inlined_call_operand.vmem [shape: f32[1,32], index: 19, kind: input, shape index: {}]   ;;  %s4266_s20 = inlined_call_operand.hbm [shape: f32[2,8,48], index: 20, kind: output, shape index: {}]  }
   0x1   :  { %4270 = sst [smem:[#allocation10_spill]] %s4246_s0 }
   0x2   :  { %4271 = sst [smem:[#allocation11_spill]] %s4247_s1 }
   0x3   :  { %4272 = sst [smem:[#allocation12_spill]] %s4248_s2 }
   0x4   :  { %4273 = sst [smem:[#allocation13_spill]] %s4249_s3 }
   0x5   :  { %4274 = sst [smem:[#allocation14_spill]] %s4250_s4 }
   0x6   :  { %4275 = sst [smem:[#allocation15_spill]] %s4251_s5 }
   0x7   :  { %4276 = sst [smem:[#allocation16_spill]] %s4252_s6 }
   0x8   :  { %4277 = sst [smem:[#allocation17_spill]] %s4253_s7 }
   0x9   :  { %4278 = sst [smem:[#allocation18_spill]] %s4265_s19 }
   0xa   :  { %4279 = sst [smem:[#allocation19_spill]] %s4266_s20 }
   0xb   :  { %s4280_s23 = sld [smem:[#allocation10_spill]] }
  0x11   :  { %s25_s5 = sshll.u32 %s4280_s23, 4  ;;  %s26_s5 = int_to_ptr.vmem [resolvable:$true] %s25_s5 }
  0x12   :  { %s3566_s24 = scalar_lea.vmem %s26_s5, 16  ;;  %p3571_p1 = scmp.lt.s32.totalorder %s26_s5, %s26_s5 }
  0x13   :  { %p3567_p0 = scmp.ne.s32.totalorder %s26_s5, %s3566_s24  ;;  %p3572_p2 = scmp.lt.s32.totalorder %s3566_s24, %s3566_s24 }
  0x15   :  { %p3573_p3 = por %p3572_p2, %p3571_p1 }
  0x17   :  { %p3574_p4 = pnand %p3573_p3, %p3567_p0 }
  0x19   :  { %3577 = shalt.err (!%p3574_p4)  }
  0x1a   :  { %s3616_s2 = smov [#allocation4]  }
  0x1b   :  { %28 = dma.vmem_to_smem %s26_s5, 16, %s3616_s2, [#allocation3] }
  0x1c   :  { %3606 = dma.done.wait [#allocation3], 16 }
  0x1d   :  { %3607 = vsyncadd [#allocation3], 4294967280 }
  0x1e   :  { %30 = sfence }
  0x1f   :  { %31 = vsyncpa [#allocation6], 0  ;;  %s3748_s25 = smov 0  }
  0x20 LB: > { %4281 = sst [smem:[#allocation9_spill]] %s3614_s25  ;;  %s3754_s3 = sadd.s32 4294967295, %s3614_s25   ;;  %s3614_s25 = sphi %s3748_s25, %s37_s25  }
  0x21   : > { %p2975_p5 = scmp.ge.s32.totalorder %s3614_s25, 1  ;;  %p634_p6 = scmp.lt.s32.totalorder %s3614_s25, 3 }
  0x23   : > { %p635_p7 = pnand %p2975_p5, %p634_p6 }
  0x24   : > { %p724_p8 = scmp.lt.s32.totalorder (!%p635_p7), %s3754_s3, 1  ;;  %s789_s5 = sld [smem:[#allocation4]] (!%p635_p7) }
  0x25   : > { %638 = sbr.rel (%p635_p7) target bundleno = 6458 (0x193a), region = 96  ;;  %s4282_s7 = sld [smem:[#allocation17_spill]] (!%p635_p7) }
  0x26   : > { %s4283_s6 = sld [smem:[#allocation16_spill]] (!%p635_p7)  ;;  %p2983_p9 = scmp.ne.s32.totalorder (!%p635_p7), %s3754_s3, 0 }
  0x2a   : > { %v769_v0 = vlaneseq  ;;  %s3760_s26 = scalar_select %p724_p8, %s3754_s3, 1  ;;  %v790_v7 = vstv %s789_s5  ;;  %v3617_v13 = vmov 0.0  }
  0x2b   : > { %s4287_s1 = sld [smem:[#allocation11_spill]] (!%p2983_p9) }
  0x2c   : > { %v3762_v1 = vshrl.u32 %v769_v0, 7  ;;  %v3764_v2 = vand.u32 127, %v769_v0  ;;  %s3132_s27 = sshll.u32 %s3760_s26, 4  ;;  %s731_s29 = scalar_lea.vmem %s4282_s7, %s3760_s26 }
  0x2d   : > { %s728_s21 = scalar_lea.vmem %s4283_s6, %s3132_s27  ;;  %s736_s23 = scalar_lea.vmem %s4254_s8, %s3132_s27  ;;  %v3777_v3 = vld [vmem:[%s731_s29] ss:$0 sm:$0xff] }
  0x2e   : > { %s739_s25 = scalar_lea.vmem %s4255_s9, %s3760_s26  ;;  %s742_s28 = scalar_lea.vmem %s4256_s10, %s3760_s26  ;;  %v3787_v4 = vld [vmem:[%s728_s21] sm:$0xf]  ;;  %v3789_v5 = vld [vmem:[%s728_s21 + $0x4] sm:$0xf]  ;;  %v775_v6 = vld [vmem:[%s728_s21 + $0x8] sm:$0xf]  ;;  %vm791_vm0 = vcmp.lt.s32.totalorder %v3762_v1, %v790_v7  ;;  %vm3800_vm1 = vcmp.lt.s32.totalorder %v3764_v2, %v790_v7 }
  0x2f   : > { %s745_s27 = scalar_lea.vmem %s4257_s11, %s3760_s26  ;;  %s3454_s29 = smul.u32 48, %s3760_s26  ;;  %v776_v8 = vld [vmem:[%s728_s21 + $0xc] sm:$0xf]  ;;  %v3796_v9 = vld [vmem:[%s736_s23] sm:$0xf]  ;;  %v3814_v14 = vsel %vm791_vm0, 1.0, %v3617_v13 }
  0x30   : > { %s753_s5 = scalar_lea.vmem %s4259_s13, %s3760_s26  ;;  %s3455_s0 = smul.u32 96, %s3760_s26  ;;  %v3809_v11 = vld [vmem:[%s736_s23 + $0x4] sm:$0xf]  ;;  %v3811_v12 = vld [vmem:[%s736_s23 + $0x8] sm:$0xf] }
  0x31   : > { %s3819_s22 = scalar_lea.vmem %s4258_s12, %s3454_s29  ;;  %s761_s4 = scalar_lea.vmem %s4261_s15, %s3760_s26  ;;  %v3825_v15 = vld [vmem:[%s736_s23 + $0xc] sm:$0xf]  ;;  %v3827_v16 = vld [vmem:[%s739_s25] ss:$0 sm:$0xff] }
  0x32   : > { %v3829_v17 = vld [vmem:[%s742_s28] ss:$0 sm:$0xff]  ;;  %s3834_s20 = scalar_lea.vmem %s4260_s14, %s3455_s0  ;;  %s764_s29 = scalar_lea.vmem %s4262_s16, %s3760_s26 }
  0x33   : > { %v3840_v18 = vld [vmem:[%s745_s27] ss:$0 sm:$0xff]  ;;  %s767_s28 = scalar_lea.vmem %s4263_s17, %s3760_s26  ;;  %798 = sbr.rel (%p2983_p9) target bundleno = 271 (0x10f), region = 100 }
  0x34   : > { %v3842_v19 = vld [vmem:[%s753_s5] ss:$0 sm:$0xff]  ;;  %s4286_s27 = sld [smem:[#allocation14_spill]] (!%p2983_p9) }
  0x35   : > { %v3844_v20 = vld [vmem:[%s761_s4] ss:$0 sm:$0xff]  ;;  %s4288_s4 = sld [smem:[#allocation15_spill]] (!%p2983_p9) }
  0x36   : > { %v3850_v21 = vld [vmem:[%s764_s29] ss:$0 sm:$0xff]  ;;  %s4289_s29 = sld [smem:[#allocation12_spill]] (!%p2983_p9) }
  0x37   : > { %v3852_v22 = vld [vmem:[%s767_s28] ss:$0 sm:$0xff] }
  0x38   : > { %v3618_v24 = vmov 0.0   ;;  %vm3619_vm2 = vmmov 0   ;;  %v799_v26 = vld [vmem:[%s4287_s1] sm:$0xff]  ;;  %vm824_vm3 = vcmask 261120  }
  0x39   : > { %3222 = vmatprep.subr.bf16.mxu0 %v3618_v24  ;;  %3226 = vmatprep.mubr.msk.bf16.mxu0 %vm3619_vm2, %v3618_v24  ;;  %v800_v27 = vpack.c.bf16 %v799_v26, %v799_v26 }
  0x3a   : > { %v3494_v23 = vld [vmem:[%s4286_s27 + $0x8] sm:$0xff]   ;;  %v3495_v25 = vld [vmem:[%s4286_s27] sm:$0xff]  }
  0x3b   : > { %3223 = vmatpush3.bf16.msra.mxu0 %v3494_v23  ;;  %v2984_v28 = vld [vmem:[%s4288_s4] ss:$0 sm:$0xff] }
  0x3c   : > { %3224 = vmatprep.subr.bf16.mxu0 %v3618_v24  ;;  %v868_v30 = vld [vmem:[%s4289_s29] sm:$0xff] }
  0x3f   : > { %3225 = vmatpush3.bf16.msra.mxu0 %v3495_v25 }
  0x42   : > { %3227 = vmatmul.mubr.msk.bf16.vlgmr.msra.gmra.mxu0 %vm824_vm3, %v800_v27 }
 0x102   : > { %v862_v29 = vpop.f32.mrf.mxu0 }
 0x103   : > { %v863_v31 = vadd.f32 %v2984_v28, %v862_v29 }
 0x104   : > { %v3228_v32 = vpop.f32.mrf.mxu0 }
 0x105   : > { %v869_v33 = vadd.f32 %v868_v30, %v863_v31 }
 0x106   : > { %v865_v34 = vpop.f32.mrf.mxu0 }
 0x107   : > { %v870_v35 = vmul.f32 5.656854, %v869_v33 }
 0x108   : > { %v3229_v36 = vpop.f32.mrf.mxu0 }
 0x109   : > { %vm871_vm4 = vcmp.gt.f32.partialorder %v870_v35, 0.0  ;;  %v872_v37 = vmul.f32 0.1, %v870_v35 }
 0x10b   : > { %v873_v38 = vsel %vm871_vm4, %v870_v35, %v872_v37 }
 0x10c   : > { %v874_v39 = vmul.f32 %v3814_v14, %v873_v38 }
 0x10e   : > { %875 = vst.msk [vmem:[#allocation2] sm:$0xff] %vm824_vm3, %v874_v39 }
 0x10f PF: > { %3230 = vmatprep.subr.bf16.mxu0 %v3617_v13  ;;  %v3874_v40 = vcombine.low %v775_v6, %v776_v8  ;;  %vm896_vm5 = vcmask 261120   ;;  %3238 = vmatprep.subr.bf16.mxu1 %v3617_v13  ;;  %vm3620_vm6 = vmmov 0   ;;  %v3886_v42 = vcombine.low %v3787_v4, %v3789_v5  ;;  %s3621_s23 = smov 112   ;;  %s3622_s25 = smov 96  }
 0x110   : > { %3234 = vmatprep.mubr.msk.bf16.mxu0 %vm3620_vm6, %v3617_v13  ;;  %3240 = vmatprep.mubr.msk.bf16.mxu1 %vm3620_vm6, %v3617_v13  ;;  %vm956_vm7 = vcmask 130048   ;;  %vm1056_vm8 = vcmask 64512   ;;  %s3623_s28 = smov 64   ;;  %vm1086_vm9 = vcmask 1043456   ;;  %s3624_s6 = smov 16   ;;  %vm1276_vm10 = vcmp.ge.s32.totalorder %v3762_v1, 1 }
 0x111   : > { %3231 = vmatpush3.bf16.msra.mxu0 %v3874_v40  ;;  %vm1402_vm11 = vcmp.lt.s32.totalorder %v3762_v1, 7  ;;  %vm1522_vm12 = vcmask 523264   ;;  %p3054_p10 = scmp.ne.s32.totalorder %s3754_s3, 1 }
 0x112   : > { %3232 = vmatprep.subr.bf16.mxu0 %v3617_v13  ;;  %s4290_s1 = sld [smem:[#allocation13_spill]] (!%p3054_p10)  ;;  %s3627_s24 = smov (!%p3054_p10), 16  }
 0x113   : > { %s4291_s30 = sld [smem:[#allocation18_spill]] (!%p3054_p10)  ;;  %s3628_s19 = smov (!%p3054_p10), 112  }
 0x114   : > { %s3629_s29 = smov (!%p3054_p10), 32  }
 0x115   : > { %v3876_v41 = vld [vmem:[#allocation2] sm:$0xff]  ;;  %3233 = vmatpush3.bf16.msra.mxu0 %v3886_v42 }
 0x116   : > { %v877_v43 = vpack.c.bf16 %v3876_v41, %v3876_v41  ;;  %3244 = vmatprep.subr.bf16.mxu0 %v3617_v13 }
 0x118   : > { %3235 = vmatmul.mubr.msk.bf16.vlgmr.msra.gmra.mxu0 %vm896_vm5, %v877_v43 }
 0x119   : > { %3246 = vmatprep.mubr.msk.bf16.mxu0 %vm3620_vm6, %v3617_v13 }
 0x1d8   : > { %v934_v44 = vpop.f32.mrf.mxu0 }
 0x1d9   : > { %v935_v45 = vadd.f32 %v3777_v3, %v934_v44 }
 0x1da   : > { %v3236_v46 = vpop.f32.mrf.mxu0 }
 0x1db   : > { %948 = vrot.lane.b32.xlu0 %v935_v45, %s3621_s23  ;;  %v940_v47 = vmul.f32 0.25, %v935_v45  ;;  %v951_v50 = vpack.c.bf16 %v935_v45, %v935_v45 }
 0x1dc   : > { %v937_v48 = vpop.f32.mrf.mxu0 }
 0x1dd   : > { %942 = vrot.lane.b32.xlu1 %v940_v47, %s3621_s23  ;;  %v945_v56 = vpack.c.bf16 %v940_v47, %v940_v47 }
 0x1de   : > { %v3237_v49 = vpop.f32.mrf.mxu0 }
 0x1df   : > { %v3933_v49 = vcombine.low %v3811_v12, %v3825_v15 }
 0x1e1   : > { %954 = vrot.lane.b32.xlu1 %v951_v50, %s3622_s25 }
 0x24d   : > { %v949_v51 = vpop.permute.xlu0 %948 }
 0x24e   : > { %v952_v52 = vpack.c.bf16 %v949_v51, %v949_v51 }
 0x24f   : > { %v943_v53 = vpop.permute.xlu1 %942 }
 0x250   : > { %1004 = vrot.lane.b32.xlu0 %v952_v52, %s3622_s25  ;;  %v946_v59 = vpack.c.bf16 %v943_v53, %v943_v53 }
 0x253   : > { %v955_v54 = vpop.permute.xlu1 %954 }
 0x254   : > { %v961_v55 = vsel %vm956_vm7, %v955_v54, 0  ;;  %v3939_v54 = vcombine.low %v3796_v9, %v3809_v11 }
 0x255   : > { %3239 = vmatpush3.bf16.xpose.msra.mxu1 %v961_v55 }
 0x256   : > { %3250 = vmatprep.subr.bf16.mxu1 %v3617_v13 }
 0x25c   : > { %3241 = vmatmul.mubr.msk.bf16.vlgmr.msra.gmra.mxu1 %vm956_vm7, %v945_v56 }
 0x25d   : > { %3252 = vmatprep.mubr.msk.bf16.mxu1 %vm3620_vm6, %v3617_v13 }
 0x2c2   : > { %v1005_v57 = vpop.permute.xlu0 %1004 }
 0x2c3   : > { %v1010_v58 = vsel %vm956_vm7, %v1005_v57, 0 }
 0x2c4   : > { %3245 = vmatpush3.bf16.xpose.msra.mxu0 %v1010_v58 }
 0x2c5   : > { %3256 = vmatprep.subr.bf16.mxu0 %v3617_v13 }
 0x2cb   : > { %3247 = vmatmul.mubr.msk.bf16.vlgmr.msra.gmra.mxu0 %vm956_vm7, %v946_v59 }
 0x2cc   : > { %3258 = vmatprep.mubr.msk.bf16.mxu0 %vm3620_vm6, %v3617_v13 }
 0x31c   : > { %v997_v60 = vpop.f32.mrf.mxu1 }
 0x31d   : > { %v1054_v61 = vsel %vm3800_vm1, %v997_v60, -10000.0 }
 0x31e   : > { %v3242_v62 = vpop.f32.mrf.mxu1  ;;  %v1057_v63 = vsel %vm1056_vm8, %v1054_v61, -inf }
 0x31f   : > { %1058 = vmax.xlane.f32.xlu1 %v1057_v63 }
 0x320   : > { %v1000_v0 = vpop.f32.mrf.mxu1 }
 0x322   : > { %v3243_v4 = vpop.f32.mrf.mxu1 }
 0x38b   : > { %v1046_v5 = vpop.f32.mrf.mxu0 }
 0x38c   : > { %v1055_v6 = vsel %vm3800_vm1, %v1046_v5, -10000.0 }
 0x38d   : > { %v3248_v7 = vpop.f32.mrf.mxu0  ;;  %v1060_v8 = vsel %vm1056_vm8, %v1055_v6, -inf }
 0x38e   : > { %1061 = vmax.xlane.f32.xlu0 %v1060_v8 }
 0x38f   : > { %v1049_v23 = vpop.f32.mrf.mxu0 }
 0x390   : > { %v3496_v23 = vld [vmem:[%s3819_s22 + $0x18] sm:$0xff]  }
 0x391   : > { %v3249_v24 = vpop.f32.mrf.mxu0 }
 0x392   : > { %v3497_v24 = vld [vmem:[%s3819_s22 + $0x8] sm:$0xff]  }
 0x3a8   : > { %v1059_v25 = vpop.xlane.xlu1 %1058 }
 0x3a9   : > { %v1063_v26 = vsub.f32 %v1054_v61, %v1059_v25  ;;  %v3498_v25 = vld [vmem:[%s3819_s22 + $0x10] sm:$0xff]  }
 0x3ab   : > { %v1065_v27 = vmul.f32 1.442695, %v1063_v26 }
 0x3ad   : > { %3514 = vpow2.f32 %v1065_v27 }
 0x3ba   : > { %v3515_v28 = vpop.eup %3514 }
 0x3bb   : > { %v1069_v29 = vsel %vm1056_vm8, %v3515_v28, 0.0 }
 0x3bc   : > { %1070 = vadd.xlane.f32.xlu1 %v1069_v29 }
 0x3cd   : > { %1081 = vrot.lane.b32.xlu1 %v951_v50, %s3623_s28 }
 0x417   : > { %v1062_v30 = vpop.xlane.xlu0 %1061 }
 0x418   : > { %v1064_v10 = vsub.f32 %v1055_v6, %v1062_v30 }
 0x41a   : > { %v1067_v31 = vmul.f32 1.442695, %v1064_v10 }
 0x41c   : > { %3516 = vpow2.f32 %v1067_v31 }
 0x429   : > { %v3517_v32 = vpop.eup %3516 }
 0x42a   : > { %v1072_v33 = vsel %vm1056_vm8, %v3517_v32, 0.0 }
 0x42b   : > { %1073 = vadd.xlane.f32.xlu0 %v1072_v33  ;;  %v3500_v33 = vld [vmem:[%s3819_s22 + $0x28] sm:$0xff]  }
 0x441   : > { %1130 = vrot.lane.b32.xlu0 %v952_v52, %s3623_s28 }
 0x445   : > { %v1071_v34 = vpop.xlane.xlu1 %1070 }
 0x446   : > { %3518 = vrcp.f32 %v1071_v34 }
 0x449   : > { %v1082_v35 = vpop.permute.xlu1 %1081 }
 0x44a   : > { %v1088_v36 = vsel %vm1086_vm9, %v1082_v35, 0 }
 0x44b   : > { %3251 = vmatpush3.bf16.msra.mxu1 %v1088_v36 }
 0x44c   : > { %3262 = vmatprep.subr.bf16.mxu1 %v3617_v13 }
 0x453   : > { %v3519_v37 = vpop.eup %3518 }
 0x454   : > { %v1077_v38 = vmul.f32 %v3519_v37, %v3515_v28 }
 0x456   : > { %v1079_v39 = vpack.c.bf16 %v1077_v38, %v1077_v38 }
 0x458   : > { %3253 = vmatmul.mubr.msk.bf16.vlgmr.msra.gmra.mxu1 %vm1056_vm8, %v1079_v39  ;;  %v3501_v39 = vld [vmem:[%s3819_s22 + $0x20] sm:$0xff]  }
 0x459   : > { %3266 = vmatprep.mubr.msk.bf16.mxu1 %vm3620_vm6, %v3617_v13  ;;  %3263 = vmatpush3.bf16.msra.mxu1 %v3933_v49 }
 0x45a   : > { %3264 = vmatprep.subr.bf16.mxu1 %v3617_v13 }
 0x45d   : > { %3265 = vmatpush3.bf16.msra.mxu1 %v3939_v54 }
 0x45e   : > { %3278 = vmatprep.subr.bf16.mxu1 %v3617_v13 }
 0x4b4   : > { %v1074_v43 = vpop.xlane.xlu0 %1073 }
 0x4b5   : > { %3520 = vrcp.f32 %v1074_v43 }
 0x4b8   : > { %v1131_v44 = vpop.permute.xlu0 %1130 }
 0x4b9   : > { %v1136_v45 = vsel %vm1086_vm9, %v1131_v44, 0 }
 0x4ba   : > { %3257 = vmatpush3.bf16.msra.mxu0 %v1136_v45  ;;  %v3502_v45 = vld [vmem:[%s3834_s20 + $0x38] sm:$0xff]  }
 0x4bb   : > { %3270 = vmatprep.subr.bf16.mxu0 %v3617_v13 }
 0x4c2   : > { %v3521_v46 = vpop.eup %3520 }
 0x4c3   : > { %v1078_v47 = vmul.f32 %v3521_v46, %v3517_v32  ;;  %v3503_v46 = vld [vmem:[%s3834_s20 + $0x30] sm:$0xff]  }
 0x4c5   : > { %v1080_v48 = vpack.c.bf16 %v1078_v47, %v1078_v47  ;;  %v3504_v47 = vld [vmem:[%s3834_s20 + $0x18] sm:$0xff]  }
 0x4c7   : > { %3259 = vmatmul.mubr.msk.bf16.vlgmr.msra.gmra.mxu0 %vm1056_vm8, %v1080_v48  ;;  %v3505_v48 = vld [vmem:[%s3834_s20 + $0x28] sm:$0xff]  }
 0x4c8   : > { %3274 = vmatprep.mubr.msk.bf16.mxu0 %vm3620_vm6, %v3617_v13  ;;  %3271 = vmatpush3.bf16.msra.mxu0 %v3496_v23 }
 0x4c9   : > { %3272 = vmatprep.subr.bf16.mxu0 %v3617_v13 }
 0x4cc   : > { %3273 = vmatpush3.bf16.msra.mxu0 %v3498_v25 }
 0x4cd   : > { %3286 = vmatprep.subr.bf16.mxu0 %v3617_v13 }
 0x518   : > { %v1124_v50 = vpop.f32.mrf.mxu1 }
 0x51a   : > { %v3254_v51 = vpop.f32.mrf.mxu1 }
 0x51b   : > { %v3507_v51 = vld [vmem:[%s3834_s20 + $0x20] sm:$0xff]  }
 0x51c   : > { %v1127_v52 = vpop.f32.mrf.mxu1 }
 0x51d   : > { %v3508_v52 = vld [vmem:[%s3834_s20 + $0x8] sm:$0xff]  }
 0x51e   : > { %v3255_v53 = vpop.f32.mrf.mxu1 }
 0x51f   : > { %v3509_v53 = vld [vmem:[%s3834_s20] sm:$0xff]  }
 0x587   : > { %v1172_v55 = vpop.f32.mrf.mxu0 }
 0x588   : > { %1179 = vrot.lane.b32.xlu0 %v1172_v55, %s3624_s6 }
 0x589   : > { %v3260_v12 = vpop.f32.mrf.mxu0 }
 0x58b   : > { %v1175_v15 = vpop.f32.mrf.mxu0 }
 0x58d   : > { %v3261_v56 = vpop.f32.mrf.mxu0 }
 0x5fa   : > { %v1180_v57 = vpop.permute.xlu0 %1179 }
 0x5fb   : > { %v1182_v58 = vsel %vm956_vm7, %v1124_v50, %v1180_v57  ;;  %v3506_v50 = vld [vmem:[%s3834_s20 + $0x10] sm:$0xff]  }
 0x5fc   : > { %v1183_v59 = vpack.c.bf16 %v1182_v58, %v1182_v58 }
 0x5fe   : > { %3267 = vmatmul.mubr.msk.bf16.vlgmr.msra.gmra.mxu1 %vm896_vm5, %v1183_v59 }
 0x5ff   : > { %3282 = vmatprep.mubr.msk.bf16.mxu1 %vm3620_vm6, %v3617_v13  ;;  %3279 = vmatpush3.bf16.msra.mxu1 %v3497_v24 }
 0x600   : > { %3280 = vmatprep.subr.bf16.mxu1 %v3617_v13 }
 0x6be   : > { %v1239_v9 = vpop.f32.mrf.mxu1 }
 0x6bf   : > { %v1240_v11 = vadd.f32 %v3827_v16, %v1239_v9 }
 0x6c0   : > { %v3268_v60 = vpop.f32.mrf.mxu1 }
 0x6c1   : > { %v1245_v61 = vadd.f32 %v1240_v11, %v3876_v41  ;;  %v3499_v41 = vld [vmem:[%s3819_s22] sm:$0xff]  }
 0x6c2   : > { %v1242_v62 = vpop.f32.mrf.mxu1  ;;  %3281 = vmatpush3.bf16.msra.mxu1 %v3499_v41  ;;  %v3511_v41 = vld [vmem:[%s3834_s20 + $0x50] sm:$0xff]  }
 0x6c3   : > { %v1246_v63 = vsel %vm896_vm5, %v1245_v61, 0.0  ;;  %3294 = vmatprep.subr.bf16.mxu1 %v3617_v13 }
 0x6c4   : > { %1247 = vadd.xlane.f32.xlu1 %v1246_v63  ;;  %v3269_v0 = vpop.f32.mrf.mxu1 }
 0x74d   : > { %v1248_v4 = vpop.xlane.xlu1 %1247 }
 0x74e   : > { %v1250_v5 = vmul.f32 0.03125, %v1248_v4 }
 0x750   : > { %v1251_v6 = vsub.f32 %v1245_v61, %v1250_v5 }
 0x752   : > { %v1252_v7 = vmul.f32 %v1251_v6, %v1251_v6 }
 0x754   : > { %v1253_v8 = vsel %vm896_vm5, %v1252_v7, 0.0  ;;  %v3510_v7 = vld [vmem:[%s3834_s20 + $0x58] sm:$0xff]  }
 0x755   : > { %1254 = vadd.xlane.f32.xlu0 %v1253_v8 }
 0x7de   : > { %v1255_v26 = vpop.xlane.xlu0 %1254 }
 0x7df   : > { %v1256_v27 = vmul.f32 0.03125, %v1255_v26  ;;  %v3512_v26 = vld [vmem:[%s3834_s20 + $0x48] sm:$0xff]  }
 0x7e1   : > { %v1257_v28 = vadd.f32 1e-05, %v1256_v27 }
 0x7e3   : > { %3522 = vrsqrt.f32 %v1257_v28  ;;  %v3513_v28 = vld [vmem:[%s3834_s20 + $0x40] sm:$0xff]  }
 0x7f0   : > { %v3523_v29 = vpop.eup %3522 }
 0x7f1   : > { %v1259_v30 = vmul.f32 %v3523_v29, %v1251_v6 }
 0x7f3   : > { %v1266_v10 = vmul.f32 %v3829_v17, %v1259_v30 }
 0x7f5   : > { %v3962_v31 = vadd.f32 %v3840_v18, %v1266_v10 }
 0x7f7   : > { %v1274_v32 = vmul.f32 %v3814_v14, %v3962_v31 }
 0x7f9   : > { %v1285_v34 = vpack.c.bf16 %v1274_v32, %v1274_v32  ;;  %v1275_v35 = vrot.slane %v1274_v32, 7  ;;  %v1401_v36 = vrot.slane %v1274_v32, 1 }
 0x7fb   : > { %3275 = vmatmul.mubr.msk.bf16.vlgmr.msra.gmra.mxu0 %vm896_vm5, %v1285_v34  ;;  %v1279_v37 = vsel %vm1276_vm10, %v1275_v35, 0.0  ;;  %v1405_v43 = vsel %vm1402_vm11, %v1401_v36, 0.0 }
 0x7fc   : > { %3287 = vmatpush3.bf16.msra.mxu0 %v3500_v33  ;;  %v1280_v38 = vpack.c.bf16 %v1279_v37, %v1279_v37  ;;  %3290 = vmatprep.mubr.msk.bf16.mxu0 %vm3620_vm6, %v3617_v13  ;;  %v1406_v44 = vpack.c.bf16 %v1405_v43, %v1405_v43 }
 0x7fd   : > { %3288 = vmatprep.subr.bf16.mxu0 %v3617_v13 }
 0x7fe   : > { %3283 = vmatmul.mubr.msk.bf16.vlgmr.msra.gmra.mxu1 %vm896_vm5, %v1280_v38 }
 0x7ff   : > { %3302 = vmatprep.mubr.msk.bf16.mxu1 %vm3620_vm6, %v3617_v13  ;;  %3295 = vmatpush3.bf16.msra.mxu1 %v3502_v45 }
 0x800   : > { %3289 = vmatpush3.bf16.msra.mxu0 %v3501_v39  ;;  %3296 = vmatprep.subr.bf16.mxu1 %v3617_v13 }
 0x801   : > { %3306 = vmatprep.subr.bf16.mxu0 %v3617_v13 }
 0x803   : > { %3291 = vmatmul.mubr.msk.bf16.vlgmr.msra.gmra.mxu0 %vm896_vm5, %v1406_v44  ;;  %3297 = vmatpush3.bf16.msra.mxu1 %v3503_v46 }
 0x804   : > { %3314 = vmatprep.mubr.msk.bf16.mxu0 %vm3620_vm6, %v3617_v13  ;;  %3307 = vmatpush3.bf16.msra.mxu0 %v3504_v47 }
 0x805   : > { %3298 = vmatprep.subr.bf16.mxu1 %v3617_v13  ;;  %3308 = vmatprep.subr.bf16.mxu0 %v3617_v13 }
 0x807   : > { %3299 = vmatpush3.bf16.msra.mxu1 %v3505_v48 }
 0x808   : > { %3309 = vmatpush3.bf16.msra.mxu0 %v3506_v50  ;;  %3300 = vmatprep.subr.bf16.mxu1 %v3617_v13 }
 0x809   : > { %3310 = vmatprep.subr.bf16.mxu0 %v3617_v13 }
 0x80b   : > { %3301 = vmatpush3.bf16.msra.mxu1 %v3507_v51 }
 0x80c   : > { %3311 = vmatpush3.bf16.msra.mxu0 %v3508_v52  ;;  %3318 = vmatprep.subr.bf16.mxu1 %v3617_v13 }
 0x80d   : > { %3312 = vmatprep.subr.bf16.mxu0 %v3617_v13 }
 0x810   : > { %3313 = vmatpush3.bf16.msra.mxu0 %v3509_v53 }
 0x8bb   : > { %v1340_v55 = vpop.f32.mrf.mxu0 }
 0x8bd   : > { %v3276_v12 = vpop.f32.mrf.mxu0 }
 0x8be   : > { %v1395_v15 = vpop.f32.mrf.mxu1 }
 0x8bf   : > { %v1343_v56 = vpop.f32.mrf.mxu0  ;;  %v1396_v59 = vadd.f32 %v1395_v15, %v1340_v55 }
 0x8c0   : > { %v3284_v57 = vpop.f32.mrf.mxu1 }
 0x8c1   : > { %v3277_v58 = vpop.f32.mrf.mxu0 }
 0x8c2   : > { %v1398_v9 = vpop.f32.mrf.mxu1 }
 0x8c3   : > { %v1461_v11 = vpop.f32.mrf.mxu0 }
 0x8c4   : > { %v1467_v60 = vadd.f32 %v1461_v11, %v1396_v59  ;;  %v3285_v61 = vpop.f32.mrf.mxu1 }
 0x8c5   : > { %v3292_v62 = vpop.f32.mrf.mxu0 }
 0x8c6   : > { %v1474_v63 = vadd.f32 %v3842_v19, %v1467_v60 }
 0x8c7   : > { %v1464_v0 = vpop.f32.mrf.mxu0 }
 0x8c8   : > { %v1475_v4 = vmax.f32 %v1474_v63, 0.0 }
 0x8c9   : > { %v3293_v5 = vpop.f32.mrf.mxu0 }
 0x8ca   : > { %v1476_v6 = vmul.f32 %v3814_v14, %v1475_v4 }
 0x8cc   : > { %v1477_v8 = vrot.slane %v1476_v6, 7  ;;  %v1488_v23 = vpack.c.bf16 %v1476_v6, %v1476_v6  ;;  %v1633_v27 = vrot.slane %v1476_v6, 1 }
 0x8ce   : > { %v1478_v24 = vsel %vm1276_vm10, %v1477_v8, 0.0  ;;  %3303 = vmatmul.mubr.msk.bf16.vlgmr.msra.gmra.mxu1 %vm1522_vm12, %v1488_v23  ;;  %v1634_v29 = vsel %vm1402_vm11, %v1633_v27, 0.0 }
 0x8cf   : > { %v1479_v25 = vpack.c.bf16 %v1478_v24, %v1478_v24  ;;  %3319 = vmatpush3.bf16.msra.mxu1 %v3510_v7  ;;  %3326 = vmatprep.mubr.msk.bf16.mxu1 %vm3620_vm6, %v3617_v13  ;;  %v1635_v30 = vpack.c.bf16 %v1634_v29, %v1634_v29 }
 0x8d0   : > { %3320 = vmatprep.subr.bf16.mxu1 %v3617_v13 }
 0x8d1   : > { %3315 = vmatmul.mubr.msk.bf16.vlgmr.msra.gmra.mxu0 %vm1522_vm12, %v1479_v25 }
 0x8d3   : > { %3321 = vmatpush3.bf16.msra.mxu1 %v3511_v41 }
 0x8d4   : > { %3322 = vmatprep.subr.bf16.mxu1 %v3617_v13 }
 0x8d7   : > { %3323 = vmatpush3.bf16.msra.mxu1 %v3512_v26 }
 0x8d8   : > { %3324 = vmatprep.subr.bf16.mxu1 %v3617_v13 }
 0x8db   : > { %3325 = vmatpush3.bf16.msra.mxu1 %v3513_v28 }
 0x8de   : > { %3327 = vmatmul.mubr.msk.bf16.vlgmr.msra.gmra.mxu1 %vm1522_vm12, %v1635_v30 }
 0x98e   : > { %v1560_v10 = vpop.f32.mrf.mxu1 }
 0x990   : > { %v3304_v32 = vpop.f32.mrf.mxu1 }
 0x991   : > { %v1627_v33 = vpop.f32.mrf.mxu0 }
 0x992   : > { %v1563_v34 = vpop.f32.mrf.mxu1  ;;  %v1628_v39 = vadd.f32 %v1627_v33, %v1560_v10 }
 0x993   : > { %v3316_v35 = vpop.f32.mrf.mxu0 }
 0x994   : > { %v3305_v36 = vpop.f32.mrf.mxu1 }
 0x995   : > { %v1630_v37 = vpop.f32.mrf.mxu0 }
 0x997   : > { %v3317_v38 = vpop.f32.mrf.mxu0 }
 0x99e   : > { %v1706_v43 = vpop.f32.mrf.mxu1 }
 0x99f   : > { %v1712_v44 = vadd.f32 %v1706_v43, %v1628_v39 }
 0x9a0   : > { %v3328_v45 = vpop.f32.mrf.mxu1 }
 0x9a1   : > { %v1719_v46 = vadd.f32 %v3844_v20, %v1712_v44 }
 0x9a2   : > { %v1709_v47 = vpop.f32.mrf.mxu1 }
 0x9a3   : > { %v1720_v48 = vmul.f32 %v3814_v14, %v1719_v46 }
 0x9a4   : > { %v3329_v50 = vpop.f32.mrf.mxu1 }
 0x9a5   : > { %v1721_v51 = vadd.f32 %v1720_v48, %v3962_v31 }
 0x9a7   : > { %v1722_v52 = vsel %vm896_vm5, %v1721_v51, 0.0 }
 0x9a8   : > { %1723 = vadd.xlane.f32.xlu0 %v1722_v52 }
 0xa31   : > { %v1724_v53 = vpop.xlane.xlu0 %1723 }
 0xa32   : > { %v1725_v55 = vmul.f32 0.03125, %v1724_v53 }
 0xa34   : > { %v1726_v12 = vsub.f32 %v1721_v51, %v1725_v55 }
 0xa36   : > { %v1727_v15 = vmul.f32 %v1726_v12, %v1726_v12 }
 0xa38   : > { %v1728_v56 = vsel %vm896_vm5, %v1727_v15, 0.0 }
 0xa39   : > { %1729 = vadd.xlane.f32.xlu1 %v1728_v56 }
 0xac2   : > { %v1730_v57 = vpop.xlane.xlu1 %1729 }
 0xac3   : > { %v1731_v58 = vmul.f32 0.03125, %v1730_v57 }
 0xac5   : > { %v1732_v59 = vadd.f32 1e-05, %v1731_v58 }
 0xac7   : > { %3524 = vrsqrt.f32 %v1732_v59 }
 0xad4   : > { %v3525_v9 = vpop.eup %3524 }
 0xad5   : > { %v1734_v11 = vmul.f32 %v3525_v9, %v1726_v12 }
 0xad7   : > { %v1741_v60 = vmul.f32 %v3850_v21, %v1734_v11  ;;  %1753 = sbr.rel (%p3054_p10) target bundleno = 3242 (0xcaa), region = 104 }
 0xad9   : > { %v1748_v31 = vadd.f32 %v3852_v22, %v1741_v60 }
 0xadb   : > { %1749 = vst.msk [vmem:[#allocation2] sm:$0xff] %vm896_vm5, %v1748_v31 }
 0xadc   : > { %v3526_v61 = vld [vmem:[%s4264_s18 + $0x8] sm:$0xff]   ;;  %v3625_v62 = vmov 0.0   ;;  %v1754_v63 = vmul.f32 %v3814_v14, %v1748_v31  ;;  %v3527_v0 = vld [vmem:[%s4264_s18] sm:$0xff]   ;;  %vm3626_vm13 = vmmov 0   ;;  %vm1843_vm14 = vcmask 392192  }
 0xadd   : > { %3330 = vmatprep.subr.bf16.mxu0 %v3625_v62  ;;  %3334 = vmatprep.mubr.msk.bf16.mxu0 %vm3626_vm13, %v3625_v62  ;;  %v1825_v4 = vld [vmem:[%s4290_s1] sm:$0xff] }
 0xade   : > { %3331 = vmatpush3.bf16.msra.mxu0 %v3526_v61  ;;  %1827 = vrot.lane.b32.xlu0 %v1825_v4, %s3627_s24  ;;  %v1755_v5 = vpack.c.bf16 %v1754_v63, %v1754_v63  ;;  %v3055_v6 = vld [vmem:[%s4291_s30] ss:$0 sm:$0xff] }
 0xadf   : > { %3332 = vmatprep.subr.bf16.mxu0 %v3625_v62 }
 0xae2   : > { %3333 = vmatpush3.bf16.msra.mxu0 %v3527_v0 }
 0xae5   : > { %3335 = vmatmul.mubr.msk.bf16.vlgmr.msra.gmra.mxu0 %vm896_vm5, %v1755_v5 }
 0xb50   : > { %v1828_v27 = vpop.permute.xlu0 %1827 }
 0xba5   : > { %v1816_v7 = vpop.f32.mrf.mxu0 }
 0xba6   : > { %v1817_v8 = vadd.f32 %v3055_v6, %v1816_v7 }
 0xba7   : > { %v3336_v23 = vpop.f32.mrf.mxu0 }
 0xba8   : > { %v1822_v24 = vmul.f32 %v3814_v14, %v1817_v8 }
 0xba9   : > { %v1819_v25 = vpop.f32.mrf.mxu0 }
 0xbaa   : > { %v1823_v41 = vmul.f32 1.442695, %v1822_v24 }
 0xbab   : > { %v3337_v26 = vpop.f32.mrf.mxu0 }
 0xbac   : > { %3528 = vpow2.f32 %v1823_v41 }
 0xbb9   : > { %v3529_v28 = vpop.eup %3528 }
 0xbba   : > { %v1830_v29 = vmul.f32 %v3529_v28, %v1828_v27 }
 0xbbc   : > { %v1831_v30 = vmul.f32 0.66666, %v1830_v29 }
 0xbbe   : > { %1833 = vrot.lane.b32.xlu0 %v1831_v30, %s3628_s19 }
 0xc30   : > { %v1834_v10 = vpop.permute.xlu0 %1833 }
 0xc31   : > { %v1836_v32 = vadd.f32 %v1834_v10, %v1822_v24 }
 0xc33   : > { %v1837_v33 = vmul.f32 %v3814_v14, %v1836_v32 }
 0xc35   : > { %1839 = vrot.lane.b32.xlu1 %v1837_v33, %s3629_s29 }
 0xca7   : > { %v1840_v34 = vpop.permute.xlu1 %1839 }
 0xca8   : > { %v1842_v35 = vsel %vm896_vm5, %v1822_v24, %v1840_v34 }
 0xca9   : > { %1844 = vst.msk [vmem:[#allocation5] sm:$0xff] %vm1843_vm14, %v1842_v35 }
 0xcaa PF: > { %s3059_s7 = sld [smem:[#allocation4 + $0x1]] }
 0xcab   : > { %s4294_s0 = sld [smem:[#allocation14_spill]] (!%p2983_p9) }
 0xcac   : > { %s4295_s2 = sld [smem:[#allocation11_spill]] (!%p2983_p9) }
 0xcad   : > { %s4296_s19 = sld [smem:[#allocation15_spill]] (!%p2983_p9) }
 0xcae   : > { %1853 = sbr.rel (%p2983_p9) target bundleno = 3465 (0xd89), region = 108  ;;  %s4297_s27 = sld [smem:[#allocation12_spill]] (!%p2983_p9) }
 0xcb0   : > { %v1846_v36 = vstv %s3059_s7 }
 0xcb1   : > { %vm1847_vm15 = vcmp.lt.s32.totalorder %v3762_v1, %v1846_v36  ;;  %vm4048_vm0 = vcmp.lt.s32.totalorder %v3764_v2, %v1846_v36 }
 0xcb2   : > { %v4053_v38 = vsel %vm1847_vm15, 1.0, %v3617_v13 }
 0xcb3   : > { %v3530_v14 = vld [vmem:[%s4294_s0 + $0x8] sm:$0xff]   ;;  %v3630_v39 = vmov 0.0   ;;  %v3531_v2 = vld [vmem:[%s4294_s0] sm:$0xff]   ;;  %vm3631_vm1 = vmmov 0  }
 0xcb4   : > { %3338 = vmatprep.subr.bf16.mxu0 %v3630_v39  ;;  %3342 = vmatprep.mubr.msk.bf16.mxu0 %vm3631_vm1, %v3630_v39  ;;  %v3062_v43 = vld [vmem:[%s4295_s2 + $0x8] sm:$0xff]  ;;  %v3063_v45 = vld [vmem:[%s4296_s19] ss:$0 sm:$0xff] }
 0xcb5   : > { %3339 = vmatpush3.bf16.msra.mxu0 %v3530_v14  ;;  %v1856_v44 = vpack.c.bf16 %v3062_v43, %v3062_v43  ;;  %v3067_v47 = vld [vmem:[%s4297_s27 + $0x8] sm:$0xff] }
 0xcb6   : > { %3340 = vmatprep.subr.bf16.mxu0 %v3630_v39 }
 0xcb9   : > { %3341 = vmatpush3.bf16.msra.mxu0 %v3531_v2 }
 0xcbc   : > { %3343 = vmatmul.mubr.msk.bf16.vlgmr.msra.gmra.mxu0 %vm896_vm5, %v1856_v44 }
 0xd7c   : > { %v1917_v46 = vpop.f32.mrf.mxu0 }
 0xd7d   : > { %v1918_v48 = vadd.f32 %v3063_v45, %v1917_v46 }
 0xd7e   : > { %v3344_v50 = vpop.f32.mrf.mxu0 }
 0xd7f   : > { %v1925_v51 = vadd.f32 %v3067_v47, %v1918_v48 }
 0xd80   : > { %v1920_v52 = vpop.f32.mrf.mxu0 }
 0xd81   : > { %v1926_v53 = vmul.f32 5.656854, %v1925_v51 }
 0xd82   : > { %v3345_v55 = vpop.f32.mrf.mxu0 }
 0xd83   : > { %vm1927_vm2 = vcmp.gt.f32.partialorder %v1926_v53, 0.0  ;;  %v1928_v12 = vmul.f32 0.1, %v1926_v53 }
 0xd85   : > { %v1929_v15 = vsel %vm1927_vm2, %v1926_v53, %v1928_v12 }
 0xd86   : > { %v1930_v56 = vmul.f32 %v4053_v38, %v1929_v15 }
 0xd88   : > { %1932 = vst.msk [vmem:[#allocation2 + $0x8] sm:$0xff] %vm896_vm5, %v1930_v56 }
 0xd89 PF: > { %3346 = vmatprep.subr.bf16.mxu0 %v3617_v13  ;;  %3350 = vmatprep.mubr.msk.bf16.mxu0 %vm3620_vm6, %v3617_v13  ;;  %s4298_s5 = sld [smem:[#allocation13_spill]] (!%p3054_p10)  ;;  %s3634_s0 = smov (!%p3054_p10), 16  }
 0xd8a   : > { %3347 = vmatpush3.bf16.msra.mxu0 %v3874_v40  ;;  %3354 = vmatprep.subr.bf16.mxu1 %v3617_v13  ;;  %s4299_s1 = sld [smem:[#allocation18_spill]] (!%p3054_p10)  ;;  %s3635_s24 = smov (!%p3054_p10), 112  }
 0xd8b   : > { %3348 = vmatprep.subr.bf16.mxu0 %v3617_v13  ;;  %3356 = vmatprep.mubr.msk.bf16.mxu1 %vm3620_vm6, %v3617_v13  ;;  %s3636_s2 = smov (!%p3054_p10), 32  }
 0xd8e   : > { %3349 = vmatpush3.bf16.msra.mxu0 %v3886_v42 }
 0xd8f   : > { %v4078_v57 = vld [vmem:[#allocation2 + $0x8] sm:$0xff]  ;;  %3360 = vmatprep.subr.bf16.mxu0 %v3617_v13 }
 0xd90   : > { %v1935_v58 = vpack.c.bf16 %v4078_v57, %v4078_v57 }
 0xd92   : > { %3351 = vmatmul.mubr.msk.bf16.vlgmr.msra.gmra.mxu0 %vm896_vm5, %v1935_v58 }
 0xd93   : > { %3362 = vmatprep.mubr.msk.bf16.mxu0 %vm3620_vm6, %v3617_v13 }
 0xe52   : > { %v1973_v40 = vpop.f32.mrf.mxu0 }
 0xe53   : > { %v1974_v59 = vadd.f32 %v3777_v3, %v1973_v40 }
 0xe54   : > { %v3352_v9 = vpop.f32.mrf.mxu0 }
 0xe55   : > { %1987 = vrot.lane.b32.xlu0 %v1974_v59, %s3621_s23  ;;  %v1979_v11 = vmul.f32 0.25, %v1974_v59  ;;  %v1990_v61 = vpack.c.bf16 %v1974_v59, %v1974_v59 }
 0xe56   : > { %v1976_v60 = vpop.f32.mrf.mxu0 }
 0xe57   : > { %1981 = vrot.lane.b32.xlu1 %v1979_v11, %s3621_s23  ;;  %v1984_v3 = vpack.c.bf16 %v1979_v11, %v1979_v11 }
 0xe58   : > { %v3353_v31 = vpop.f32.mrf.mxu0 }
 0xe5b   : > { %1993 = vrot.lane.b32.xlu1 %v1990_v61, %s3622_s25 }
 0xec7   : > { %v1988_v42 = vpop.permute.xlu0 %1987 }
 0xec8   : > { %v1991_v62 = vpack.c.bf16 %v1988_v42, %v1988_v42 }
 0xec9   : > { %v1982_v63 = vpop.permute.xlu1 %1981 }
 0xeca   : > { %2042 = vrot.lane.b32.xlu0 %v1991_v62, %s3622_s25  ;;  %v1985_v7 = vpack.c.bf16 %v1982_v63, %v1982_v63 }
 0xecd   : > { %v1994_v0 = vpop.permute.xlu1 %1993 }
 0xece   : > { %v1999_v4 = vsel %vm956_vm7, %v1994_v0, 0 }
 0xecf   : > { %3355 = vmatpush3.bf16.xpose.msra.mxu1 %v1999_v4 }
 0xed0   : > { %3366 = vmatprep.subr.bf16.mxu1 %v3617_v13 }
 0xed6   : > { %3357 = vmatmul.mubr.msk.bf16.vlgmr.msra.gmra.mxu1 %vm956_vm7, %v1984_v3 }
 0xed7   : > { %3368 = vmatprep.mubr.msk.bf16.mxu1 %vm3620_vm6, %v3617_v13 }
 0xf3c   : > { %v2043_v5 = vpop.permute.xlu0 %2042 }
 0xf3d   : > { %v2048_v6 = vsel %vm956_vm7, %v2043_v5, 0 }
 0xf3e   : > { %3361 = vmatpush3.bf16.xpose.msra.mxu0 %v2048_v6 }
 0xf3f   : > { %3372 = vmatprep.subr.bf16.mxu0 %v3617_v13 }
 0xf45   : > { %3363 = vmatmul.mubr.msk.bf16.vlgmr.msra.gmra.mxu0 %vm956_vm7, %v1985_v7 }
 0xf46   : > { %3374 = vmatprep.mubr.msk.bf16.mxu0 %vm3620_vm6, %v3617_v13 }
 0xf96   : > { %v2035_v8 = vpop.f32.mrf.mxu1 }
 0xf97   : > { %v2092_v23 = vsel %vm4048_vm0, %v2035_v8, -10000.0 }
 0xf98   : > { %v3358_v24 = vpop.f32.mrf.mxu1  ;;  %v2094_v25 = vsel %vm1056_vm8, %v2092_v23, -inf }
 0xf99   : > { %2095 = vmax.xlane.f32.xlu1 %v2094_v25 }
 0xf9a   : > { %v2038_v41 = vpop.f32.mrf.mxu1 }
 0xf9b   : > { %v3532_v41 = vld [vmem:[%s3819_s22 + $0x18] sm:$0xff]  }
 0xf9c   : > { %v3359_v26 = vpop.f32.mrf.mxu1 }
 0xf9d   : > { %v3533_v26 = vld [vmem:[%s3819_s22 + $0x8] sm:$0xff]  }
0x1005   : > { %v2084_v27 = vpop.f32.mrf.mxu0 }
0x1006   : > { %v2093_v28 = vsel %vm4048_vm0, %v2084_v27, -10000.0 }
0x1007   : > { %v3364_v29 = vpop.f32.mrf.mxu0  ;;  %v2097_v30 = vsel %vm1056_vm8, %v2093_v28, -inf }
0x1008   : > { %2098 = vmax.xlane.f32.xlu0 %v2097_v30 }
0x1009   : > { %v2087_v10 = vpop.f32.mrf.mxu0 }
0x100b   : > { %v3365_v32 = vpop.f32.mrf.mxu0 }
0x1022   : > { %v2096_v33 = vpop.xlane.xlu1 %2095 }
0x1023   : > { %v2100_v34 = vsub.f32 %v2092_v23, %v2096_v33 }
0x1025   : > { %v2102_v35 = vmul.f32 1.442695, %v2100_v34 }
0x1027   : > { %3550 = vpow2.f32 %v2102_v35  ;;  %v3536_v35 = vld [vmem:[%s3819_s22 + $0x28] sm:$0xff]  }
0x1034   : > { %v3551_v36 = vpop.eup %3550 }
0x1035   : > { %v2106_v14 = vsel %vm1056_vm8, %v3551_v36, 0.0 }
0x1036   : > { %2107 = vadd.xlane.f32.xlu1 %v2106_v14 }
0x1047   : > { %2118 = vrot.lane.b32.xlu1 %v1990_v61, %s3623_s28 }
0x1091   : > { %v2099_v39 = vpop.xlane.xlu0 %2098 }
0x1092   : > { %v2101_v2 = vsub.f32 %v2093_v28, %v2099_v39 }
0x1094   : > { %v2104_v37 = vmul.f32 1.442695, %v2101_v2 }
0x1096   : > { %3552 = vpow2.f32 %v2104_v37 }
0x10a3   : > { %v3553_v43 = vpop.eup %3552 }
0x10a4   : > { %v2109_v44 = vsel %vm1056_vm8, %v3553_v43, 0.0 }
0x10a5   : > { %2110 = vadd.xlane.f32.xlu0 %v2109_v44  ;;  %v3538_v44 = vld [vmem:[%s3834_s20 + $0x38] sm:$0xff]  }
0x10bb   : > { %2166 = vrot.lane.b32.xlu0 %v1991_v62, %s3623_s28 }
0x10bf   : > { %v2108_v45 = vpop.xlane.xlu1 %2107 }
0x10c0   : > { %3554 = vrcp.f32 %v2108_v45  ;;  %v3539_v45 = vld [vmem:[%s3834_s20 + $0x30] sm:$0xff]  }
0x10c3   : > { %v2119_v46 = vpop.permute.xlu1 %2118 }
0x10c4   : > { %v2124_v47 = vsel %vm1086_vm9, %v2119_v46, 0  ;;  %v3540_v46 = vld [vmem:[%s3834_s20 + $0x18] sm:$0xff]  }
0x10c5   : > { %3367 = vmatpush3.bf16.msra.mxu1 %v2124_v47  ;;  %v3541_v47 = vld [vmem:[%s3834_s20 + $0x28] sm:$0xff]  }
0x10c6   : > { %3378 = vmatprep.subr.bf16.mxu1 %v3617_v13 }
0x10cd   : > { %v3555_v48 = vpop.eup %3554 }
0x10ce   : > { %v2114_v50 = vmul.f32 %v3555_v48, %v3551_v36  ;;  %v3542_v48 = vld [vmem:[%s3834_s20 + $0x10] sm:$0xff]  }
0x10d0   : > { %v2116_v51 = vpack.c.bf16 %v2114_v50, %v2114_v50  ;;  %v3543_v50 = vld [vmem:[%s3834_s20 + $0x20] sm:$0xff]  }
0x10d2   : > { %3369 = vmatmul.mubr.msk.bf16.vlgmr.msra.gmra.mxu1 %vm1056_vm8, %v2116_v51  ;;  %v3544_v51 = vld [vmem:[%s3834_s20 + $0x8] sm:$0xff]  }
0x10d3   : > { %3379 = vmatpush3.bf16.msra.mxu1 %v3933_v49  ;;  %3382 = vmatprep.mubr.msk.bf16.mxu1 %vm3620_vm6, %v3617_v13 }
0x10d4   : > { %3380 = vmatprep.subr.bf16.mxu1 %v3617_v13 }
0x10d7   : > { %3381 = vmatpush3.bf16.msra.mxu1 %v3939_v54 }
0x10d8   : > { %3394 = vmatprep.subr.bf16.mxu1 %v3617_v13 }
0x112e   : > { %v2111_v52 = vpop.xlane.xlu0 %2110 }
0x112f   : > { %3556 = vrcp.f32 %v2111_v52  ;;  %v3545_v52 = vld [vmem:[%s3834_s20] sm:$0xff]  }
0x1132   : > { %v2167_v53 = vpop.permute.xlu0 %2166 }
0x1133   : > { %v2172_v55 = vsel %vm1086_vm9, %v2167_v53, 0 }
0x1134   : > { %3373 = vmatpush3.bf16.msra.mxu0 %v2172_v55 }
0x1135   : > { %3386 = vmatprep.subr.bf16.mxu0 %v3617_v13 }
0x113c   : > { %v3557_v12 = vpop.eup %3556 }
0x113d   : > { %v2115_v15 = vmul.f32 %v3557_v12, %v3553_v43 }
0x113f   : > { %v2117_v49 = vpack.c.bf16 %v2115_v15, %v2115_v15 }
0x1141   : > { %3375 = vmatmul.mubr.msk.bf16.vlgmr.msra.gmra.mxu0 %vm1056_vm8, %v2117_v49 }
0x1142   : > { %3390 = vmatprep.mubr.msk.bf16.mxu0 %vm3620_vm6, %v3617_v13  ;;  %3387 = vmatpush3.bf16.msra.mxu0 %v3532_v41 }
0x1143   : > { %3388 = vmatprep.subr.bf16.mxu0 %v3617_v13 }
0x1192   : > { %v2160_v56 = vpop.f32.mrf.mxu1 }
0x1194   : > { %v3370_v54 = vpop.f32.mrf.mxu1 }
0x1196   : > { %v2163_v58 = vpop.f32.mrf.mxu1 }
0x1198   : > { %v3371_v40 = vpop.f32.mrf.mxu1 }
0x1201   : > { %v2208_v59 = vpop.f32.mrf.mxu0 }
0x1202   : > { %2215 = vrot.lane.b32.xlu0 %v2208_v59, %s3624_s6 }
0x1203   : > { %v3376_v9 = vpop.f32.mrf.mxu0 }
0x1205   : > { %v2211_v11 = vpop.f32.mrf.mxu0 }
0x1207   : > { %v3377_v60 = vpop.f32.mrf.mxu0 }
0x1274   : > { %v2216_v31 = vpop.permute.xlu0 %2215 }
0x1275   : > { %v2218_v61 = vsel %vm956_vm7, %v2160_v56, %v2216_v31 }
0x1276   : > { %v2219_v42 = vpack.c.bf16 %v2218_v61, %v2218_v61 }
0x1278   : > { %3383 = vmatmul.mubr.msk.bf16.vlgmr.msra.gmra.mxu1 %vm896_vm5, %v2219_v42 }
0x1279   : > { %3398 = vmatprep.mubr.msk.bf16.mxu1 %vm3620_vm6, %v3617_v13  ;;  %3395 = vmatpush3.bf16.msra.mxu1 %v3533_v26 }
0x127a   : > { %3396 = vmatprep.subr.bf16.mxu1 %v3617_v13 }
0x1338   : > { %v2257_v62 = vpop.f32.mrf.mxu1 }
0x1339   : > { %v2258_v63 = vadd.f32 %v3827_v16, %v2257_v62  ;;  %v3534_v16 = vld [vmem:[%s3819_s22 + $0x10] sm:$0xff]  }
0x133a   : > { %v3384_v0 = vpop.f32.mrf.mxu1  ;;  %3389 = vmatpush3.bf16.msra.mxu0 %v3534_v16 }
0x133b   : > { %v2263_v4 = vadd.f32 %v2258_v63, %v4078_v57  ;;  %3402 = vmatprep.subr.bf16.mxu0 %v3617_v13  ;;  %v3535_v57 = vld [vmem:[%s3819_s22] sm:$0xff]   ;;  %v3546_v63 = vld [vmem:[%s3834_s20 + $0x58] sm:$0xff]  }
0x133c   : > { %v2260_v3 = vpop.f32.mrf.mxu1  ;;  %3397 = vmatpush3.bf16.msra.mxu1 %v3535_v57 }
0x133d   : > { %v2264_v5 = vsel %vm896_vm5, %v2263_v4, 0.0  ;;  %3410 = vmatprep.subr.bf16.mxu1 %v3617_v13 }
0x133e   : > { %2265 = vadd.xlane.f32.xlu1 %v2264_v5  ;;  %v3385_v6 = vpop.f32.mrf.mxu1 }
0x133f   : > { %v3547_v6 = vld [vmem:[%s3834_s20 + $0x50] sm:$0xff]  }
0x13c7   : > { %v2266_v7 = vpop.xlane.xlu1 %2265 }
0x13c8   : > { %v2267_v8 = vmul.f32 0.03125, %v2266_v7 }
0x13ca   : > { %v2268_v23 = vsub.f32 %v2263_v4, %v2267_v8  ;;  %v3549_v8 = vld [vmem:[%s3834_s20 + $0x40] sm:$0xff]  }
0x13cc   : > { %v2269_v24 = vmul.f32 %v2268_v23, %v2268_v23 }
0x13ce   : > { %v2270_v25 = vsel %vm896_vm5, %v2269_v24, 0.0 }
0x13cf   : > { %2271 = vadd.xlane.f32.xlu0 %v2270_v25 }
0x1458   : > { %v2272_v27 = vpop.xlane.xlu0 %2271 }
0x1459   : > { %v2273_v28 = vmul.f32 0.03125, %v2272_v27 }
0x145b   : > { %v2274_v29 = vadd.f32 1e-05, %v2273_v28 }
0x145d   : > { %3558 = vrsqrt.f32 %v2274_v29 }
0x146a   : > { %v3559_v30 = vpop.eup %3558 }
0x146b   : > { %v2276_v10 = vmul.f32 %v3559_v30, %v2268_v23 }
0x146d   : > { %v2277_v32 = vmul.f32 %v3829_v17, %v2276_v10  ;;  %v3537_v17 = vld [vmem:[%s3819_s22 + $0x20] sm:$0xff]  }
0x146f   : > { %v4150_v33 = vadd.f32 %v3840_v18, %v2277_v32 }
0x1471   : > { %v2279_v34 = vmul.f32 %v4053_v38, %v4150_v33 }
0x1473   : > { %v2287_v36 = vpack.c.bf16 %v2279_v34, %v2279_v34  ;;  %v2280_v14 = vrot.slane %v2279_v34, 7  ;;  %v2402_v39 = vrot.slane %v2279_v34, 1 }
0x1475   : > { %3391 = vmatmul.mubr.msk.bf16.vlgmr.msra.gmra.mxu0 %vm896_vm5, %v2287_v36  ;;  %v2281_v2 = vsel %vm1276_vm10, %v2280_v14, 0.0  ;;  %v2403_v18 = vsel %vm1402_vm11, %v2402_v39, 0.0 }
0x1476   : > { %3403 = vmatpush3.bf16.msra.mxu0 %v3536_v35  ;;  %v2282_v37 = vpack.c.bf16 %v2281_v2, %v2281_v2  ;;  %3406 = vmatprep.mubr.msk.bf16.mxu0 %vm3620_vm6, %v3617_v13  ;;  %v2404_v43 = vpack.c.bf16 %v2403_v18, %v2403_v18 }
0x1477   : > { %3404 = vmatprep.subr.bf16.mxu0 %v3617_v13 }
0x1478   : > { %3399 = vmatmul.mubr.msk.bf16.vlgmr.msra.gmra.mxu1 %vm896_vm5, %v2282_v37 }
0x1479   : > { %3418 = vmatprep.mubr.msk.bf16.mxu1 %vm3620_vm6, %v3617_v13  ;;  %3411 = vmatpush3.bf16.msra.mxu1 %v3538_v44 }
0x147a   : > { %3405 = vmatpush3.bf16.msra.mxu0 %v3537_v17  ;;  %3412 = vmatprep.subr.bf16.mxu1 %v3617_v13 }
0x147b   : > { %3422 = vmatprep.subr.bf16.mxu0 %v3617_v13 }
0x147d   : > { %3407 = vmatmul.mubr.msk.bf16.vlgmr.msra.gmra.mxu0 %vm896_vm5, %v2404_v43  ;;  %3413 = vmatpush3.bf16.msra.mxu1 %v3539_v45 }
0x147e   : > { %3430 = vmatprep.mubr.msk.bf16.mxu0 %vm3620_vm6, %v3617_v13  ;;  %3423 = vmatpush3.bf16.msra.mxu0 %v3540_v46 }
0x147f   : > { %3414 = vmatprep.subr.bf16.mxu1 %v3617_v13  ;;  %3424 = vmatprep.subr.bf16.mxu0 %v3617_v13 }
0x1481   : > { %3415 = vmatpush3.bf16.msra.mxu1 %v3541_v47 }
0x1482   : > { %3425 = vmatpush3.bf16.msra.mxu0 %v3542_v48  ;;  %3416 = vmatprep.subr.bf16.mxu1 %v3617_v13 }
0x1483   : > { %3426 = vmatprep.subr.bf16.mxu0 %v3617_v13 }
0x1485   : > { %3417 = vmatpush3.bf16.msra.mxu1 %v3543_v50 }
0x1486   : > { %3427 = vmatpush3.bf16.msra.mxu0 %v3544_v51  ;;  %3434 = vmatprep.subr.bf16.mxu1 %v3617_v13 }
0x1487   : > { %3428 = vmatprep.subr.bf16.mxu0 %v3617_v13 }
0x148a   : > { %3429 = vmatpush3.bf16.msra.mxu0 %v3545_v52 }
0x1535   : > { %v2341_v53 = vpop.f32.mrf.mxu0 }
0x1537   : > { %v3392_v55 = vpop.f32.mrf.mxu0 }
0x1538   : > { %v2396_v12 = vpop.f32.mrf.mxu1 }
0x1539   : > { %v2344_v15 = vpop.f32.mrf.mxu0  ;;  %v2397_v54 = vadd.f32 %v2396_v12, %v2341_v53 }
0x153a   : > { %v3400_v49 = vpop.f32.mrf.mxu1 }
0x153b   : > { %v3393_v56 = vpop.f32.mrf.mxu0 }
0x153c   : > { %v2399_v58 = vpop.f32.mrf.mxu1 }
0x153d   : > { %v2458_v40 = vpop.f32.mrf.mxu0 }
0x153e   : > { %v2464_v59 = vadd.f32 %v2458_v40, %v2397_v54  ;;  %v3401_v9 = vpop.f32.mrf.mxu1 }
0x153f   : > { %v3408_v11 = vpop.f32.mrf.mxu0 }
0x1540   : > { %v2465_v60 = vadd.f32 %v3842_v19, %v2464_v59  ;;  %v3548_v19 = vld [vmem:[%s3834_s20 + $0x48] sm:$0xff]  }
0x1541   : > { %v2461_v31 = vpop.f32.mrf.mxu0 }
0x1542   : > { %v2466_v61 = vmax.f32 %v2465_v60, 0.0 }
0x1543   : > { %v3409_v42 = vpop.f32.mrf.mxu0 }
0x1544   : > { %v2467_v62 = vmul.f32 %v4053_v38, %v2466_v61 }
0x1546   : > { %v2468_v0 = vrot.slane %v2467_v62, 7  ;;  %v2479_v4 = vpack.c.bf16 %v2467_v62, %v2467_v62  ;;  %v2622_v7 = vrot.slane %v2467_v62, 1 }
0x1548   : > { %v2469_v3 = vsel %vm1276_vm10, %v2468_v0, 0.0  ;;  %3419 = vmatmul.mubr.msk.bf16.vlgmr.msra.gmra.mxu1 %vm1522_vm12, %v2479_v4  ;;  %v2623_v23 = vsel %vm1402_vm11, %v2622_v7, 0.0 }
0x1549   : > { %v2470_v5 = vpack.c.bf16 %v2469_v3, %v2469_v3  ;;  %3435 = vmatpush3.bf16.msra.mxu1 %v3546_v63  ;;  %3442 = vmatprep.mubr.msk.bf16.mxu1 %vm3620_vm6, %v3617_v13  ;;  %v2624_v24 = vpack.c.bf16 %v2623_v23, %v2623_v23 }
0x154a   : > { %3436 = vmatprep.subr.bf16.mxu1 %v3617_v13 }
0x154b   : > { %3431 = vmatmul.mubr.msk.bf16.vlgmr.msra.gmra.mxu0 %vm1522_vm12, %v2470_v5 }
0x154d   : > { %3437 = vmatpush3.bf16.msra.mxu1 %v3547_v6 }
0x154e   : > { %3438 = vmatprep.subr.bf16.mxu1 %v3617_v13 }
0x1551   : > { %3439 = vmatpush3.bf16.msra.mxu1 %v3548_v19 }
0x1552   : > { %3440 = vmatprep.subr.bf16.mxu1 %v3617_v13 }
0x1555   : > { %3441 = vmatpush3.bf16.msra.mxu1 %v3549_v8 }
0x1558   : > { %3443 = vmatmul.mubr.msk.bf16.vlgmr.msra.gmra.mxu1 %vm1522_vm12, %v2624_v24 }
0x1608   : > { %v2549_v25 = vpop.f32.mrf.mxu1 }
0x160a   : > { %v3420_v41 = vpop.f32.mrf.mxu1 }
0x160b   : > { %v2616_v26 = vpop.f32.mrf.mxu0 }
0x160c   : > { %v2552_v16 = vpop.f32.mrf.mxu1  ;;  %v2617_v30 = vadd.f32 %v2616_v26, %v2549_v25 }
0x160d   : > { %v3432_v57 = vpop.f32.mrf.mxu0 }
0x160e   : > { %v3421_v27 = vpop.f32.mrf.mxu1 }
0x160f   : > { %v2619_v28 = vpop.f32.mrf.mxu0 }
0x1611   : > { %v3433_v29 = vpop.f32.mrf.mxu0 }
0x1618   : > { %v2694_v10 = vpop.f32.mrf.mxu1 }
0x1619   : > { %v2700_v32 = vadd.f32 %v2694_v10, %v2617_v30 }
0x161a   : > { %v3444_v34 = vpop.f32.mrf.mxu1 }
0x161b   : > { %v2701_v13 = vadd.f32 %v3844_v20, %v2700_v32 }
0x161c   : > { %v2697_v1 = vpop.f32.mrf.mxu1 }
0x161d   : > { %v2702_v35 = vmul.f32 %v4053_v38, %v2701_v13 }
0x161e   : > { %v3445_v36 = vpop.f32.mrf.mxu1 }
0x161f   : > { %v2703_v14 = vadd.f32 %v2702_v35, %v4150_v33 }
0x1621   : > { %v2704_v39 = vsel %vm896_vm5, %v2703_v14, 0.0 }
0x1622   : > { %2705 = vadd.xlane.f32.xlu0 %v2704_v39 }
0x16ab   : > { %v2706_v2 = vpop.xlane.xlu0 %2705 }
0x16ac   : > { %v2707_v37 = vmul.f32 0.03125, %v2706_v2 }
0x16ae   : > { %v2708_v17 = vsub.f32 %v2703_v14, %v2707_v37 }
0x16b0   : > { %v2709_v18 = vmul.f32 %v2708_v17, %v2708_v17 }
0x16b2   : > { %v2710_v43 = vsel %vm896_vm5, %v2709_v18, 0.0 }
0x16b3   : > { %2711 = vadd.xlane.f32.xlu1 %v2710_v43 }
0x173c   : > { %v2712_v44 = vpop.xlane.xlu1 %2711 }
0x173d   : > { %v2713_v45 = vmul.f32 0.03125, %v2712_v44 }
0x173f   : > { %v2714_v46 = vadd.f32 1e-05, %v2713_v45 }
0x1741   : > { %3560 = vrsqrt.f32 %v2714_v46 }
0x174e   : > { %v3561_v20 = vpop.eup %3560 }
0x174f   : > { %v2716_v47 = vmul.f32 %v3561_v20, %v2708_v17 }
0x1751   : > { %v2717_v48 = vmul.f32 %v3850_v21, %v2716_v47  ;;  %2722 = sbr.rel (%p3054_p10) target bundleno = 6436 (0x1924), region = 112 }
0x1753   : > { %v2718_v33 = vadd.f32 %v3852_v22, %v2717_v48 }
0x1755   : > { %2719 = vst.msk [vmem:[#allocation2 + $0x8] sm:$0xff] %vm896_vm5, %v2718_v33 }
0x1756   : > { %v3562_v50 = vld [vmem:[%s4264_s18 + $0x8] sm:$0xff]   ;;  %v3632_v51 = vmov 0.0   ;;  %v2723_v52 = vmul.f32 %v4053_v38, %v2718_v33  ;;  %v3563_v21 = vld [vmem:[%s4264_s18] sm:$0xff]   ;;  %vm3633_vm3 = vmmov 0   ;;  %vm2814_vm4 = vcmask 392192  }
0x1757   : > { %3446 = vmatprep.subr.bf16.mxu0 %v3632_v51  ;;  %3450 = vmatprep.mubr.msk.bf16.mxu0 %vm3633_vm3, %v3632_v51  ;;  %v3127_v22 = vld [vmem:[%s4298_s5 + $0x8] sm:$0xff]  ;;  %v3123_v55 = vld [vmem:[%s4299_s1] ss:$0 sm:$0xff] }
0x1758   : > { %3447 = vmatpush3.bf16.msra.mxu0 %v3562_v50  ;;  %2797 = vrot.lane.b32.xlu0 %v3127_v22, %s3634_s0  ;;  %v2724_v53 = vpack.c.bf16 %v2723_v52, %v2723_v52 }
0x1759   : > { %3448 = vmatprep.subr.bf16.mxu0 %v3632_v51 }
0x175c   : > { %3449 = vmatpush3.bf16.msra.mxu0 %v3563_v21 }
0x175f   : > { %3451 = vmatmul.mubr.msk.bf16.vlgmr.msra.gmra.mxu0 %vm896_vm5, %v2724_v53 }
0x17ca   : > { %v2798_v59 = vpop.permute.xlu0 %2797 }
0x181f   : > { %v2785_v12 = vpop.f32.mrf.mxu0 }
0x1820   : > { %v2786_v15 = vadd.f32 %v3123_v55, %v2785_v12 }
0x1821   : > { %v3452_v49 = vpop.f32.mrf.mxu0 }
0x1822   : > { %v2791_v56 = vmul.f32 %v4053_v38, %v2786_v15 }
0x1823   : > { %v2788_v54 = vpop.f32.mrf.mxu0 }
0x1824   : > { %v2792_v58 = vmul.f32 1.442695, %v2791_v56 }
0x1825   : > { %v3453_v40 = vpop.f32.mrf.mxu0 }
0x1826   : > { %3564 = vpow2.f32 %v2792_v58 }
0x1833   : > { %v3565_v9 = vpop.eup %3564 }
0x1834   : > { %v2800_v11 = vmul.f32 %v3565_v9, %v2798_v59 }
0x1836   : > { %v2801_v60 = vmul.f32 0.66666, %v2800_v11 }
0x1838   : > { %2803 = vrot.lane.b32.xlu0 %v2801_v60, %s3635_s24 }
0x18aa   : > { %v2804_v31 = vpop.permute.xlu0 %2803 }
0x18ab   : > { %v2806_v61 = vadd.f32 %v2804_v31, %v2791_v56 }
0x18ad   : > { %v2807_v42 = vmul.f32 %v4053_v38, %v2806_v61 }
0x18af   : > { %2809 = vrot.lane.b32.xlu1 %v2807_v42, %s3636_s2 }
0x1921   : > { %v2810_v62 = vpop.permute.xlu1 %2809 }
0x1922   : > { %v2812_v63 = vsel %vm896_vm5, %v2791_v56, %v2810_v62 }
0x1923   : > { %2815 = vst.msk [vmem:[#allocation5 + $0x8] sm:$0xff] %vm2814_vm4, %v2812_v63 }
0x1924 PF: > { %p3460_p11 = scmp.eq.s32.totalorder %s3754_s3, 1  ;;  %s3637_s4 = smov [#allocation5]  }
0x1925   : > { %s2822_s30 = sshll.u32 %s3637_s4, 4  ;;  %s2823_s30 = int_to_ptr.vmem [resolvable:$true] %s2822_s30 }
0x1926   : > { %s3578_s19 = scalar_lea.vmem %s2823_s30, 256  ;;  %p3585_p1 = scmp.lt.s32.totalorder %s2823_s30, %s2823_s30 }
0x1927   : > { %p3579_p12 = scmp.ne.s32.totalorder %s2823_s30, %s3578_s19  ;;  %p3586_p2 = scmp.lt.s32.totalorder %s3578_s19, %s3578_s19 }
0x1929   : > { %p3580_p13 = pnand %p3579_p12, %p3460_p11  ;;  %p3587_p3 = por %p3586_p2, %p3585_p1 }
0x192b   : > { %p3581_p0 = pneg %p3580_p13 }
0x192d   : > { %p3588_p4 = pnand %p3587_p3, %p3581_p0 }
0x192f   : > { %3591 = shalt.err (!%p3588_p4)
}
0x1930   : > { %s3638_s29 = smov 128   ;;  %s3639_s7 = smov 8  }
0x1931   : > { %s4300_s20 = sld [smem:[#allocation19_spill]] }
0x1937   : > { %3457 = dma.vmem_to_hbm [thread:$0]  (%p3460_p11), %s2823_s30, 256, %s4300_s20, [#allocation6], %s3638_s29, %s3638_s29, %s3639_s7  }
0x1938   : > { %3609 = dma.done.wait (%p3460_p11), [#allocation6], 256  }
0x1939   : > { %3611 = vsyncadd (%p3460_p11), [#allocation6], 4294967040 }
0x193a PF: > { %s4301_s23 = sld [smem:[#allocation9_spill]] }
0x1940   : > { %s37_s25 = sadd.s32 1, %s4301_s23  }
0x1941   : > { %p34_p5 = scmp.ge.s32.totalorder %s37_s25, 4  }
0x1943   :  { %36 = sbr.rel (!%p34_p5) target bundleno = 32 (0x20), region = 182 }
0x1948   :  { %2838 = vsyncpa [#allocation6], 1 }
0x1949   :  { %2840 = vsyncpa [#allocation6 + $0x1], 1 }

</bundles_post_ra>
